<compile_context>
chip_gen: v6e
topology: v6e:2x2x1
jax: 0.10.0
libtpu: 0.0.40
codegen_flags: <defaults>
</compile_context>

<pallas_src>
import jax
import jax.numpy as jnp
from jax.experimental import pallas as pl
from jax.experimental.pallas import tpu as pltpu

D_IN = 784
D_HID = 400
D_Z = 2

D_IN_PAD = 896     # 784 -> 7 * 128 (lane-dense)
D_HID_PAD = 512    # 400 -> 4 * 128
D_HEADS = 128      # fused (mu | logvar) = 4 cols, padded to one lane group


def _cdiv(a, b):
    return -(-a // b)


def _round_up(x, m):
    return _cdiv(x, m) * m


def _choose_tile_b(B, max_tile_b=512):
    """Pick (tile_b, b_pad): bound row-padding waste, multiple of 16 rows
    (bf16 sublane packing), and prefer >=2 grid steps so both v7x TCs work."""
    n_tiles = _cdiv(B, max_tile_b)
    if n_tiles < 2 and B >= 32:      # only split if each tile keeps >=16 real rows
        n_tiles = 2
    tile_b = _round_up(_cdiv(B, n_tiles), 16)
    return tile_b, tile_b * n_tiles


def _vae_kernel(x_ref,
                w1_ref, b1_ref,
                wh_ref, bh_ref,
                w3_ref, b3_ref,
                w4_ref, b4_ref,
                recon_ref, heads_ref):
    # ---- encoder ----
    # (tile_b, 896) bf16 @ (896, 512) bf16 -> f32 accumulate
    h = jnp.dot(x_ref[...], w1_ref[...], preferred_element_type=jnp.float32)
    h = jnp.maximum(h + b1_ref[...], 0.0)                          # (tile_b, 512) f32

    # fused mu|logvar head, kept f32 (feeds KL): cols 0:2 = mu, 2:4 = logvar
    heads = jnp.dot(h, wh_ref[...], preferred_element_type=jnp.float32) + bh_ref[...]
    heads_ref[...] = heads                                         # lane-dense f32 store

    # ---- decoder (eval path: z = mu) ----
    # fc3 on the MXU using the lane-padded heads tile: w3 is zero-padded to
    # 128 rows, so logvar (cols 2:4) and pad columns contribute nothing.
    h3 = jnp.dot(heads.astype(jnp.bfloat16), w3_ref[...],
                 preferred_element_type=jnp.float32)
    h3 = jnp.maximum(h3 + b3_ref[...], 0.0)                        # (tile_b, 512) f32

    logits = jnp.dot(h3.astype(jnp.bfloat16), w4_ref[...],
                     preferred_element_type=jnp.float32) + b4_ref[...]
    # sigmoid(x) = 0.5*tanh(0.5*x) + 0.5 : single EUP transcendental, bf16 store
    recon_ref[...] = (0.5 * jnp.tanh(0.5 * logits) + 0.5).astype(recon_ref.dtype)


def prepare_params(params):
    """Pad + cast weights/biases once (call outside the per-step jit and reuse)."""
    (w1, b1, wmu, bmu, wlv, blv, w3, b3, w4, b4) = params
    w1_p = jnp.pad(w1, ((0, D_IN_PAD - D_IN), (0, D_HID_PAD - D_HID))).astype(jnp.bfloat16)
    b1_p = jnp.pad(b1, ((0, 0), (0, D_HID_PAD - D_HID)))
    wh = jnp.pad(jnp.concatenate([wmu, wlv], axis=1),
                 ((0, D_HID_PAD - D_HID), (0, D_HEADS - 2 * D_Z)))          # f32
    bh = jnp.pad(jnp.concatenate([bmu, blv], axis=1),
                 ((0, 0), (0, D_HEADS - 2 * D_Z)))
    w3_p = jnp.pad(w3, ((0, D_HEADS - D_Z), (0, D_HID_PAD - D_HID))).astype(jnp.bfloat16)
    b3_p = jnp.pad(b3, ((0, 0), (0, D_HID_PAD - D_HID)))
    w4_p = jnp.pad(w4, ((0, D_HID_PAD - D_HID), (0, D_IN_PAD - D_IN))).astype(jnp.bfloat16)
    b4_p = jnp.pad(b4, ((0, 0), (0, D_IN_PAD - D_IN)))
    return (w1_p, b1_p, wh, bh, w3_p, b3_p, w4_p, b4_p)


def modern_vae_forward(x_nchw, prepared_params, *, max_tile_b=512, unpad=True):
    """x_nchw: (B, 1, 28, 28). prepared_params: output of prepare_params().
    Returns (recon (B,784) bf16, mu (B,2) f32, logvar (B,2) f32).
    With unpad=False returns the padded (b_pad, 896)/(b_pad, 128) slabs
    (cheaper if the loss is computed on padded/masked tiles downstream)."""
    B = x_nchw.shape[0]
    (w1_p, b1_p, wh, bh, w3_p, b3_p, w4_p, b4_p) = prepared_params

    tile_b, b_pad = _choose_tile_b(B, max_tile_b)
    grid = (b_pad // tile_b,)

    # Activations: flatten NCHW -> (B, 784), cast bf16, zero-pad lane-dense.
    x_flat = x_nchw.reshape(B, D_IN).astype(jnp.bfloat16)
    x_p = jnp.pad(x_flat, ((0, b_pad - B), (0, D_IN_PAD - D_IN)))

    # Batch-tiled activations; weights/biases VMEM-resident (constant index_map).
    act_spec = pl.BlockSpec((tile_b, D_IN_PAD), lambda i: (i, 0))

    def const(shape):
        return pl.BlockSpec(shape, lambda i: (0, 0))

    flops = 2 * b_pad * (D_IN_PAD * D_HID_PAD + D_HID_PAD * D_HEADS
                         + D_HEADS * D_HID_PAD + D_HID_PAD * D_IN_PAD)
    bytes_accessed = (x_p.size * 2                                   # x (bf16)
                      + (w1_p.size + w3_p.size + w4_p.size) * 2      # bf16 weights
                      + (b1_p.size + wh.size + bh.size + b3_p.size + b4_p.size) * 4
                      + b_pad * D_IN_PAD * 2                         # recon (bf16)
                      + b_pad * D_HEADS * 4)                         # heads (f32)

    recon_p, heads = pl.pallas_call(
        _vae_kernel,
        out_shape=(
            jax.ShapeDtypeStruct((b_pad, D_IN_PAD), jnp.bfloat16),
            jax.ShapeDtypeStruct((b_pad, D_HEADS), jnp.float32),
        ),
        grid=grid,
        in_specs=[
            act_spec,                                  # x (bf16)
            const((D_IN_PAD, D_HID_PAD)),              # w1 (bf16)
            const((1, D_HID_PAD)),                     # b1
            const((D_HID_PAD, D_HEADS)),               # fused mu|logvar weight (f32)
            const((1, D_HEADS)),                       # fused mu|logvar bias
            const((D_HEADS, D_HID_PAD)),               # w3 zero-padded to 128 rows (bf16)
            const((1, D_HID_PAD)),                     # b3
            const((D_HID_PAD, D_IN_PAD)),              # w4 (bf16)
            const((1, D_IN_PAD)),                      # b4
        ],
        out_specs=(
            pl.BlockSpec((tile_b, D_IN_PAD), lambda i: (i, 0)),   # recon (lane-dense, bf16)
            pl.BlockSpec((tile_b, D_HEADS), lambda i: (i, 0)),    # heads (lane-dense, f32)
        ),
        compiler_params=pltpu.CompilerParams(
            dimension_semantics=("parallel",)),
        cost_estimate=pl.CostEstimate(
            flops=flops,
            transcendentals=b_pad * D_IN_PAD,          # one tanh per recon element
            bytes_accessed=bytes_accessed),
    )(x_p, w1_p, b1_p, wh, bh, w3_p, b3_p, w4_p, b4_p)

    if not unpad:
        return recon_p, heads
    recon = recon_p[:B, :D_IN]
    mu = heads[:B, 0:D_Z]
    logvar = heads[:B, D_Z:2 * D_Z]
    return recon, mu, logvar


def init_params(key):
    """Deterministic init mimicking nn.Linear default: U(-1/sqrt(fan_in), 1/sqrt(fan_in)).
    Weights stored as (in_features, out_features); biases as (1, out)."""
    def linear(k, fan_in, fan_out):
        kw, kb = jax.random.split(k)
        bound = 1.0 / jnp.sqrt(fan_in)
        w = jax.random.uniform(kw, (fan_in, fan_out), jnp.float32, -bound, bound)
        b = jax.random.uniform(kb, (1, fan_out), jnp.float32, -bound, bound)
        return w, b

    k1, k2, k3, k4, k5 = jax.random.split(key, 5)
    w1, b1 = linear(k1, D_IN, D_HID)     # encoder.input_layer
    wmu, bmu = linear(k2, D_HID, D_Z)    # encoder.mean_layer
    wlv, blv = linear(k3, D_HID, D_Z)    # encoder.logvar_layer
    w3, b3 = linear(k4, D_Z, D_HID)      # decoder.fc3
    w4, b4 = linear(k5, D_HID, D_IN)     # decoder.fc4
    return (w1, b1, wmu, bmu, wlv, blv, w3, b3, w4, b4)


def _reference_forward(x_nchw, params):
    """Pure-JAX f32 reference of the same forward pass (for sanity check)."""
    (w1, b1, wmu, bmu, wlv, blv, w3, b3, w4, b4) = params
    x = x_nchw.reshape(x_nchw.shape[0], D_IN).astype(jnp.float32)
    h = jnp.maximum(x @ w1 + b1, 0.0)
    mu = h @ wmu + bmu
    lv = h @ wlv + blv
    z = mu
    h3 = jnp.maximum(z @ w3 + b3, 0.0)
    recon = jax.nn.sigmoid(h3 @ w4 + b4)
    return recon, mu, lv


if __name__ == "__main__":
    key = jax.random.PRNGKey(0)
    kp, kx = jax.random.split(key)

    params = init_params(kp)
    # Pad/cast weights once, outside the per-call jit (reused across calls).
    prepared = jax.tree_util.tree_map(jax.block_until_ready, prepare_params(params))

    # Small MNIST-like batch: (B, C, H, W) = (8, 1, 28, 28) -> 784 features
    x = jax.random.uniform(kx, (8, 1, 28, 28), jnp.float32)

    fwd = jax.jit(modern_vae_forward)
    recon, mu, logvar = jax.block_until_ready(fwd(x, prepared))

    # correctness check against pure-JAX f32 reference
    # (tolerance relaxed: big matmuls run in bf16, recon stored in bf16)
    r_ref, mu_ref, lv_ref = _reference_forward(x, params)
    assert recon.shape == (8, 784) and mu.shape == (8, 2) and logvar.shape == (8, 2)
    assert jnp.allclose(recon.astype(jnp.float32), r_ref, atol=2e-2)
    assert jnp.allclose(mu, mu_ref, atol=1e-2)
    assert jnp.allclose(logvar, lv_ref, atol=1e-2)

    print("KERNEL_OK")
</pallas_src>

<mosaic_0001>
module attributes {stable_mosaic.version = 11 : i64} {
  func.func @_vae_kernel(%arg0: i32, %arg1: memref<16x896xbf16, #tpu.memory_space<vmem>>, %arg2: memref<896x512xbf16, #tpu.memory_space<vmem>>, %arg3: memref<1x512xf32, #tpu.memory_space<vmem>>, %arg4: memref<512x128xf32, #tpu.memory_space<vmem>>, %arg5: memref<1x128xf32, #tpu.memory_space<vmem>>, %arg6: memref<128x512xbf16, #tpu.memory_space<vmem>>, %arg7: memref<1x512xf32, #tpu.memory_space<vmem>>, %arg8: memref<512x896xbf16, #tpu.memory_space<vmem>>, %arg9: memref<1x896xf32, #tpu.memory_space<vmem>>, %arg10: memref<16x896xbf16, #tpu.memory_space<vmem>>, %arg11: memref<16x128xf32, #tpu.memory_space<vmem>>) attributes {dimension_semantics = [#tpu.dimension_semantics<parallel>], iteration_bounds = array<i64: 1>, scalar_prefetch = 0 : i64, scratch_operands = 0 : i64, tpu.core_type = #tpu.core_type<tc>, window_params = [{transform_indices = @transform_0, window_bounds = array<i64: 16, 896>}, {pipeline_mode = #tpu.pipeline_mode<synchronous>, transform_indices = @transform_1, window_bounds = array<i64: 896, 512>}, {pipeline_mode = #tpu.pipeline_mode<synchronous>, transform_indices = @transform_2, window_bounds = array<i64: 1, 512>}, {pipeline_mode = #tpu.pipeline_mode<synchronous>, transform_indices = @transform_3, window_bounds = array<i64: 512, 128>}, {pipeline_mode = #tpu.pipeline_mode<synchronous>, transform_indices = @transform_4, window_bounds = array<i64: 1, 128>}, {pipeline_mode = #tpu.pipeline_mode<synchronous>, transform_indices = @transform_5, window_bounds = array<i64: 128, 512>}, {pipeline_mode = #tpu.pipeline_mode<synchronous>, transform_indices = @transform_6, window_bounds = array<i64: 1, 512>}, {pipeline_mode = #tpu.pipeline_mode<synchronous>, transform_indices = @transform_7, window_bounds = array<i64: 512, 896>}, {pipeline_mode = #tpu.pipeline_mode<synchronous>, transform_indices = @transform_8, window_bounds = array<i64: 1, 896>}, {transform_indices = @transform_9, window_bounds = array<i64: 16, 896>}, {transform_indices = @transform_10, window_bounds = array<i64: 16, 128>}]} {
    %c0 = arith.constant 0 : index
    %c0_0 = arith.constant 0 : index
    %0 = vector.load %arg1[%c0, %c0_0] : memref<16x896xbf16, #tpu.memory_space<vmem>>, vector<16x896xbf16>
    %c0_1 = arith.constant 0 : index
    %c0_2 = arith.constant 0 : index
    %1 = vector.load %arg2[%c0_1, %c0_2] : memref<896x512xbf16, #tpu.memory_space<vmem>>, vector<896x512xbf16>
    %cst = arith.constant dense<0.000000e+00> : vector<16x512xf32>
    %2 = tpu.matmul %0, %1, %cst {dimension_numbers = #tpu.dot_dimension_numbers<[1], [0], [0], [1], [0, 0, 1, 1], [], []>} : vector<16x896xbf16>, vector<896x512xbf16>, vector<16x512xf32> -> vector<16x512xf32>
    %c0_3 = arith.constant 0 : index
    %c0_4 = arith.constant 0 : index
    %3 = vector.load %arg3[%c0_3, %c0_4] : memref<1x512xf32, #tpu.memory_space<vmem>>, vector<1x512xf32>
    %4 = vector.broadcast %3 : vector<1x512xf32> to vector<16x512xf32>
    %5 = arith.addf %2, %4 : vector<16x512xf32>
    %cst_5 = arith.constant 0.000000e+00 : f32
    %6 = vector.broadcast %cst_5 : f32 to vector<16x512xf32>
    %7 = arith.maximumf %5, %6 : vector<16x512xf32>
    %c0_6 = arith.constant 0 : index
    %c0_7 = arith.constant 0 : index
    %8 = vector.load %arg4[%c0_6, %c0_7] : memref<512x128xf32, #tpu.memory_space<vmem>>, vector<512x128xf32>
    %cst_8 = arith.constant dense<0.000000e+00> : vector<16x128xf32>
    %9 = tpu.matmul %7, %8, %cst_8 {dimension_numbers = #tpu.dot_dimension_numbers<[1], [0], [0], [1], [0, 0, 1, 1], [], []>} : vector<16x512xf32>, vector<512x128xf32>, vector<16x128xf32> -> vector<16x128xf32>
    %c0_9 = arith.constant 0 : index
    %c0_10 = arith.constant 0 : index
    %10 = vector.load %arg5[%c0_9, %c0_10] : memref<1x128xf32, #tpu.memory_space<vmem>>, vector<1x128xf32>
    %11 = vector.broadcast %10 : vector<1x128xf32> to vector<16x128xf32>
    %12 = arith.addf %9, %11 : vector<16x128xf32>
    %c0_11 = arith.constant 0 : index
    %c0_12 = arith.constant 0 : index
    %13 = vector.load %arg11[%c0_11, %c0_12] : memref<16x128xf32, #tpu.memory_space<vmem>>, vector<16x128xf32>
    tpu.vector_store %arg11[%c0_11, %c0_12], %12 {strides = array<i32>} : memref<16x128xf32, #tpu.memory_space<vmem>>, vector<16x128xf32>,
    %14 = arith.truncf %12 : vector<16x128xf32> to vector<16x128xbf16>
    %c0_13 = arith.constant 0 : index
    %c0_14 = arith.constant 0 : index
    %15 = vector.load %arg6[%c0_13, %c0_14] : memref<128x512xbf16, #tpu.memory_space<vmem>>, vector<128x512xbf16>
    %cst_15 = arith.constant dense<0.000000e+00> : vector<16x512xf32>
    %16 = tpu.matmul %14, %15, %cst_15 {dimension_numbers = #tpu.dot_dimension_numbers<[1], [0], [0], [1], [0, 0, 1, 1], [], []>} : vector<16x128xbf16>, vector<128x512xbf16>, vector<16x512xf32> -> vector<16x512xf32>
    %c0_16 = arith.constant 0 : index
    %c0_17 = arith.constant 0 : index
    %17 = vector.load %arg7[%c0_16, %c0_17] : memref<1x512xf32, #tpu.memory_space<vmem>>, vector<1x512xf32>
    %18 = vector.broadcast %17 : vector<1x512xf32> to vector<16x512xf32>
    %19 = arith.addf %16, %18 : vector<16x512xf32>
    %cst_18 = arith.constant 0.000000e+00 : f32
    %20 = vector.broadcast %cst_18 : f32 to vector<16x512xf32>
    %21 = arith.maximumf %19, %20 : vector<16x512xf32>
    %22 = arith.truncf %21 : vector<16x512xf32> to vector<16x512xbf16>
    %c0_19 = arith.constant 0 : index
    %c0_20 = arith.constant 0 : index
    %23 = vector.load %arg8[%c0_19, %c0_20] : memref<512x896xbf16, #tpu.memory_space<vmem>>, vector<512x896xbf16>
    %cst_21 = arith.constant dense<0.000000e+00> : vector<16x896xf32>
    %24 = tpu.matmul %22, %23, %cst_21 {dimension_numbers = #tpu.dot_dimension_numbers<[1], [0], [0], [1], [0, 0, 1, 1], [], []>} : vector<16x512xbf16>, vector<512x896xbf16>, vector<16x896xf32> -> vector<16x896xf32>
    %c0_22 = arith.constant 0 : index
    %c0_23 = arith.constant 0 : index
    %25 = vector.load %arg9[%c0_22, %c0_23] : memref<1x896xf32, #tpu.memory_space<vmem>>, vector<1x896xf32>
    %26 = vector.broadcast %25 : vector<1x896xf32> to vector<16x896xf32>
    %27 = arith.addf %24, %26 : vector<16x896xf32>
    %cst_24 = arith.constant 5.000000e-01 : f32
    %28 = vector.broadcast %cst_24 : f32 to vector<16x896xf32>
    %29 = arith.mulf %28, %27 : vector<16x896xf32>
    %30 = math.tanh %29 : vector<16x896xf32>
    %cst_25 = arith.constant 5.000000e-01 : f32
    %31 = vector.broadcast %cst_25 : f32 to vector<16x896xf32>
    %32 = arith.mulf %31, %30 : vector<16x896xf32>
    %cst_26 = arith.constant 5.000000e-01 : f32
    %33 = vector.broadcast %cst_26 : f32 to vector<16x896xf32>
    %34 = arith.addf %32, %33 : vector<16x896xf32>
    %35 = arith.truncf %34 : vector<16x896xf32> to vector<16x896xbf16>
    %c0_27 = arith.constant 0 : index
    %c0_28 = arith.constant 0 : index
    %36 = vector.load %arg10[%c0_27, %c0_28] : memref<16x896xbf16, #tpu.memory_space<vmem>>, vector<16x896xbf16>
    tpu.vector_store %arg10[%c0_27, %c0_28], %35 {strides = array<i32>} : memref<16x896xbf16, #tpu.memory_space<vmem>>, vector<16x896xbf16>,
    return
  }
  func.func @transform_0(%arg0: i32) -> (i32, i32) {
    %c0_i32 = arith.constant 0 : i32
    %c0_i32_0 = arith.constant 0 : i32
    return %arg0, %c0_i32 : i32, i32
  }
  func.func @transform_1(%arg0: i32) -> (i32, i32) {
    %c0_i32 = arith.constant 0 : i32
    %c0_i32_0 = arith.constant 0 : i32
    %c0_i32_1 = arith.constant 0 : i32
    return %c0_i32, %c0_i32_0 : i32, i32
  }
  func.func @transform_2(%arg0: i32) -> (i32, i32) {
    %c0_i32 = arith.constant 0 : i32
    %c0_i32_0 = arith.constant 0 : i32
    %c0_i32_1 = arith.constant 0 : i32
    return %c0_i32, %c0_i32_0 : i32, i32
  }
  func.func @transform_3(%arg0: i32) -> (i32, i32) {
    %c0_i32 = arith.constant 0 : i32
    %c0_i32_0 = arith.constant 0 : i32
    %c0_i32_1 = arith.constant 0 : i32
    return %c0_i32, %c0_i32_0 : i32, i32
  }
  func.func @transform_4(%arg0: i32) -> (i32, i32) {
    %c0_i32 = arith.constant 0 : i32
    %c0_i32_0 = arith.constant 0 : i32
    %c0_i32_1 = arith.constant 0 : i32
    return %c0_i32, %c0_i32_0 : i32, i32
  }
  func.func @transform_5(%arg0: i32) -> (i32, i32) {
    %c0_i32 = arith.constant 0 : i32
    %c0_i32_0 = arith.constant 0 : i32
    %c0_i32_1 = arith.constant 0 : i32
    return %c0_i32, %c0_i32_0 : i32, i32
  }
  func.func @transform_6(%arg0: i32) -> (i32, i32) {
    %c0_i32 = arith.constant 0 : i32
    %c0_i32_0 = arith.constant 0 : i32
    %c0_i32_1 = arith.constant 0 : i32
    return %c0_i32, %c0_i32_0 : i32, i32
  }
  func.func @transform_7(%arg0: i32) -> (i32, i32) {
    %c0_i32 = arith.constant 0 : i32
    %c0_i32_0 = arith.constant 0 : i32
    %c0_i32_1 = arith.constant 0 : i32
    return %c0_i32, %c0_i32_0 : i32, i32
  }
  func.func @transform_8(%arg0: i32) -> (i32, i32) {
    %c0_i32 = arith.constant 0 : i32
    %c0_i32_0 = arith.constant 0 : i32
    %c0_i32_1 = arith.constant 0 : i32
    return %c0_i32, %c0_i32_0 : i32, i32
  }
  func.func @transform_9(%arg0: i32) -> (i32, i32) {
    %c0_i32 = arith.constant 0 : i32
    %c0_i32_0 = arith.constant 0 : i32
    return %arg0, %c0_i32 : i32, i32
  }
  func.func @transform_10(%arg0: i32) -> (i32, i32) {
    %c0_i32 = arith.constant 0 : i32
    %c0_i32_0 = arith.constant 0 : i32
    return %arg0, %c0_i32 : i32, i32
  }
}

</mosaic_0001>

<bundles_post_ra>
// kernel: modern_vae_forward.1
= control target key start
LH: loop header
LB: loop body
LE: loop exit
PB: predicated region body
PF: predicated region fallthrough
CT: control target
= control target key end

     0   :  { %16 = vsyncpa [#allocation3], 0  ;;  %s6142_s0 = inlined_call_operand.vmem [shape: bf16[16,896], index: 0, kind: input, shape index: {}]   ;;  %s6143_s1 = inlined_call_operand.hbm [shape: bf16[896,512], index: 1, kind: input, shape index: {}]   ;;  %s6144_s2 = inlined_call_operand.vmem [shape: f32[1,512], index: 2, kind: input, shape index: {}]   ;;  %s6145_s3 = inlined_call_operand.vmem [shape: f32[512,128], index: 3, kind: input, shape index: {}]   ;;  %s6146_s4 = inlined_call_operand.vmem [shape: f32[1,128], index: 4, kind: input, shape index: {}]   ;;  %s6147_s5 = inlined_call_operand.hbm [shape: bf16[128,512], index: 5, kind: input, shape index: {}]   ;;  %s6148_s6 = inlined_call_operand.vmem [shape: f32[1,512], index: 6, kind: input, shape index: {}]   ;;  %s6149_s7 = inlined_call_operand.hbm [shape: bf16[512,896], index: 7, kind: input, shape index: {}]   ;;  %s6150_s8 = inlined_call_operand.vmem [shape: f32[1,896], index: 8, kind: input, shape index: {}]   ;;  %s6151_s9 = inlined_call_operand.vmem [shape: bf16[16,896], index: 9, kind: output, shape index: {0}]   ;;  %s6152_s10 = inlined_call_operand.vmem [shape: f32[16,128], index: 10, kind: output, shape index: {1}]  }
   0x1   :  { %17 = vsyncpa [#allocation5], 0  ;;  %s5717_s13 = smov [#allocation4]   ;;  %s5718_s15 = smov [#allocation2]  }
   0x2   :  { %s43_s14 = sshll.u32 %s5717_s13, 4  ;;  %s25_s16 = sshll.u32 %s5718_s15, 4  ;;  %s44_s14 = int_to_ptr.vmem [resolvable:$true] %s43_s14  ;;  %s26_s16 = int_to_ptr.vmem [resolvable:$true] %s25_s16 }
   0x3   :  { %s5661_s17 = scalar_lea.vmem %s44_s14, 4096  ;;  %p5666_p1 = scmp.lt.s32.totalorder %s44_s14, %s44_s14 }
   0x4   :  { %p5662_p0 = scmp.ne.s32.totalorder %s44_s14, %s5661_s17  ;;  %p5667_p2 = scmp.lt.s32.totalorder %s5661_s17, %s5661_s17 }
   0x6   :  { %p5668_p3 = por %p5667_p2, %p5666_p1 }
   0x8   :  { %p5669_p4 = pnand %p5668_p3, %p5662_p0 }
   0xa   :  { %5672 = shalt.err (!%p5669_p4)
}
   0xb   :  { %s5719_s18 = smov 256   ;;  %s5720_s19 = smov 16  }
   0xc   :  { %49 = dma.hbm_to_vmem [thread:$0]  %s6147_s5, 4096, %s44_s14, [#allocation5], %s5719_s18, %s5719_s18, %s5720_s19  }
   0xd   :  { %s5681_s22 = scalar_lea.vmem %s26_s16, 28672  ;;  %p5686_p6 = scmp.lt.s32.totalorder %s26_s16, %s26_s16 }
   0xe   :  { %p5682_p5 = scmp.ne.s32.totalorder %s26_s16, %s5681_s22  ;;  %p5687_p7 = scmp.lt.s32.totalorder %s5681_s22, %s5681_s22 }
  0x10   :  { %p5688_p8 = por %p5687_p7, %p5686_p6 }
  0x12   :  { %p5689_p9 = pnand %p5688_p8, %p5682_p5 }
  0x14   :  { %5692 = shalt.err (!%p5689_p9)
}
  0x15   :  { %31 = dma.hbm_to_vmem [thread:$0]  %s6143_s1, 28672, %s26_s16, [#allocation3], %s5719_s18, %s5719_s18, %s5720_s19  }
  0x16   :  { %s5721_s25 = smov [#allocation6]  }
  0x17   :  { %s57_s26 = sshll.u32 %s5721_s25, 4  ;;  %s58_s26 = int_to_ptr.vmem [resolvable:$true] %s57_s26 }
  0x18   :  { %s5701_s27 = scalar_lea.vmem %s58_s26, 28672  ;;  %p5706_p11 = scmp.lt.s32.totalorder %s58_s26, %s58_s26 }
  0x19   :  { %p5702_p10 = scmp.ne.s32.totalorder %s58_s26, %s5701_s27  ;;  %p5707_p12 = scmp.lt.s32.totalorder %s5701_s27, %s5701_s27 }
  0x1b   :  { %p5708_p13 = por %p5707_p12, %p5706_p11 }
  0x1d   :  { %p5709_p0 = pnand %p5708_p13, %p5702_p10 }
  0x1f   :  { %5712 = shalt.err (!%p5709_p0)
}
  0x20   :  { %s5722_s5 = smov 448   ;;  %s5723_s28 = smov 28  }
  0x21   :  { %63 = dma.hbm_to_vmem [thread:$0]  %s6149_s7, 28672, %s58_s26, [#allocation5], %s5722_s5, %s5722_s5, %s5723_s28  }
  0x22   :  { %5713 = dma.done.wait [#allocation3], 28672  }
  0x23   :  { %5714 = vsyncadd [#allocation3], 4294938624 }
  0x24   :  { %5715 = dma.done.wait [#allocation5], 32768  }
  0x25   :  { %5716 = vsyncadd [#allocation5], 4294934528  ;;  %v4909_v0 = vld [vmem:[#allocation2 + $0xe4] ss:$16 sps:$4 sm:$0xff]   ;;  %v4913_v2 = vld [vmem:[#allocation2 + $0xe0] ss:$16 sps:$4 sm:$0xff]  }
  0x26   :  { %v4911_v1 = vld [vmem:[#allocation2 + $0x2e4] ss:$16 sps:$4 sm:$0xff]   ;;  %1486 = vmatprep.subr.bf16.mxu0 %v4909_v0  ;;  %v4914_v3 = vld [vmem:[#allocation2 + $0x2e0] ss:$16 sps:$4 sm:$0xff]   ;;  %v5797_v51 = vld [vmem:[%s6142_s0 + $0xc] ss:$28 sps:$4 sm:$0xff]  }
  0x27   :  { %1529 = vmatprep.subr.bf16.mxu1 %v4911_v1  ;;  %v4915_v4 = vld [vmem:[#allocation2 + $0xc4] ss:$16 sps:$4 sm:$0xff]   ;;  %1487 = vmatpush1.bf16.msra.mxu0 %v4913_v2  ;;  %v4919_v6 = vld [vmem:[#allocation2 + $0xc0] ss:$16 sps:$4 sm:$0xff]  }
  0x28   :  { %1530 = vmatpush1.bf16.msra.mxu1 %v4914_v3  ;;  %v4917_v5 = vld [vmem:[#allocation2 + $0x2c4] ss:$16 sps:$4 sm:$0xff]   ;;  %1488 = vmatprep.subr.bf16.mxu0 %v4915_v4  ;;  %v4920_v7 = vld [vmem:[#allocation2 + $0x2c0] ss:$16 sps:$4 sm:$0xff]  }
  0x29   :  { %1531 = vmatprep.subr.bf16.mxu1 %v4917_v5  ;;  %v4921_v8 = vld [vmem:[#allocation2 + $0xa4] ss:$16 sps:$4 sm:$0xff]   ;;  %v4925_v10 = vld [vmem:[#allocation2 + $0xa0] ss:$16 sps:$4 sm:$0xff]   ;;  %1561 = vmatprep.mubr.bf16.mxu1 %v5797_v51 }
  0x2a   :  { %v4923_v9 = vld [vmem:[#allocation2 + $0x2a4] ss:$16 sps:$4 sm:$0xff]   ;;  %v4926_v11 = vld [vmem:[#allocation2 + $0x2a0] ss:$16 sps:$4 sm:$0xff]  }
  0x2b   :  { %1489 = vmatpush1.bf16.msra.mxu0 %v4919_v6  ;;  %v4927_v12 = vld [vmem:[#allocation2 + $0x84] ss:$16 sps:$4 sm:$0xff]   ;;  %v4931_v14 = vld [vmem:[#allocation2 + $0x80] ss:$16 sps:$4 sm:$0xff]  }
  0x2c   :  { %1532 = vmatpush1.bf16.msra.mxu1 %v4920_v7  ;;  %1490 = vmatprep.subr.bf16.mxu0 %v4921_v8  ;;  %v4929_v13 = vld [vmem:[#allocation2 + $0x284] ss:$16 sps:$4 sm:$0xff]   ;;  %v4932_v15 = vld [vmem:[#allocation2 + $0x280] ss:$16 sps:$4 sm:$0xff]  }
  0x2d   :  { %1533 = vmatprep.subr.bf16.mxu1 %v4923_v9  ;;  %v4933_v16 = vld [vmem:[#allocation2 + $0x64] ss:$16 sps:$4 sm:$0xff]   ;;  %v4937_v18 = vld [vmem:[#allocation2 + $0x60] ss:$16 sps:$4 sm:$0xff]  }
  0x2e   :  { %v4935_v17 = vld [vmem:[#allocation2 + $0x264] ss:$16 sps:$4 sm:$0xff]   ;;  %v4938_v19 = vld [vmem:[#allocation2 + $0x260] ss:$16 sps:$4 sm:$0xff]  }
  0x2f   :  { %1491 = vmatpush1.bf16.msra.mxu0 %v4925_v10  ;;  %v4939_v20 = vld [vmem:[#allocation2 + $0x44] ss:$16 sps:$4 sm:$0xff]   ;;  %v4943_v22 = vld [vmem:[#allocation2 + $0x40] ss:$16 sps:$4 sm:$0xff]  }
  0x30   :  { %1534 = vmatpush1.bf16.msra.mxu1 %v4926_v11  ;;  %1492 = vmatprep.subr.bf16.mxu0 %v4927_v12  ;;  %v4941_v21 = vld [vmem:[#allocation2 + $0x244] ss:$16 sps:$4 sm:$0xff]   ;;  %v4944_v23 = vld [vmem:[#allocation2 + $0x240] ss:$16 sps:$4 sm:$0xff]  }
  0x31   :  { %1535 = vmatprep.subr.bf16.mxu1 %v4929_v13  ;;  %v4945_v24 = vld [vmem:[#allocation2 + $0x24] ss:$16 sps:$4 sm:$0xff]   ;;  %v4949_v26 = vld [vmem:[#allocation2 + $0x20] ss:$16 sps:$4 sm:$0xff]  }
  0x32   :  { %v4947_v25 = vld [vmem:[#allocation2 + $0x224] ss:$16 sps:$4 sm:$0xff]   ;;  %v4950_v27 = vld [vmem:[#allocation2 + $0x220] ss:$16 sps:$4 sm:$0xff]  }
  0x33   :  { %1493 = vmatpush1.bf16.msra.mxu0 %v4931_v14  ;;  %v4951_v28 = vld [vmem:[#allocation2 + $0x4] ss:$16 sps:$4 sm:$0xff]   ;;  %v4955_v30 = vld [vmem:[#allocation2] ss:$16 sps:$4 sm:$0xff]   ;;  %v5724_v14 = vmov 0  }
  0x34   :  { %1536 = vmatpush1.bf16.msra.mxu1 %v4932_v15  ;;  %1494 = vmatprep.subr.bf16.mxu0 %v4933_v16  ;;  %v4953_v29 = vld [vmem:[#allocation2 + $0x204] ss:$16 sps:$4 sm:$0xff]   ;;  %v4956_v31 = vld [vmem:[#allocation2 + $0x200] ss:$16 sps:$4 sm:$0xff]  }
  0x35   :  { %1537 = vmatprep.subr.bf16.mxu1 %v4935_v17  ;;  %v4957_v32 = vld [vmem:[#allocation2 + $0x1e4] ss:$16 sps:$4 sm:$0xff]   ;;  %v4961_v34 = vld [vmem:[#allocation2 + $0x1e0] ss:$16 sps:$4 sm:$0xff]  }
  0x36   :  { %v4959_v33 = vld [vmem:[#allocation2 + $0x3e4] ss:$16 sps:$4 sm:$0xff]   ;;  %v4962_v35 = vld [vmem:[#allocation2 + $0x3e0] ss:$16 sps:$4 sm:$0xff]  }
  0x37   :  { %1495 = vmatpush1.bf16.msra.mxu0 %v4937_v18  ;;  %v4963_v36 = vld [vmem:[#allocation2 + $0x1c4] ss:$16 sps:$4 sm:$0xff]   ;;  %v4967_v38 = vld [vmem:[#allocation2 + $0x1c0] ss:$16 sps:$4 sm:$0xff]  }
  0x38   :  { %1538 = vmatpush1.bf16.msra.mxu1 %v4938_v19  ;;  %1496 = vmatprep.subr.bf16.mxu0 %v4939_v20  ;;  %v4965_v37 = vld [vmem:[#allocation2 + $0x3c4] ss:$16 sps:$4 sm:$0xff]   ;;  %v4968_v39 = vld [vmem:[#allocation2 + $0x3c0] ss:$16 sps:$4 sm:$0xff]  }
  0x39   :  { %1539 = vmatprep.subr.bf16.mxu1 %v4941_v21  ;;  %v4969_v40 = vld [vmem:[#allocation2 + $0x1a4] ss:$16 sps:$4 sm:$0xff]   ;;  %v4973_v42 = vld [vmem:[#allocation2 + $0x1a0] ss:$16 sps:$4 sm:$0xff]  }
  0x3a   :  { %v4971_v41 = vld [vmem:[#allocation2 + $0x3a4] ss:$16 sps:$4 sm:$0xff]   ;;  %v4974_v43 = vld [vmem:[#allocation2 + $0x3a0] ss:$16 sps:$4 sm:$0xff]  }
  0x3b   :  { %1497 = vmatpush1.bf16.msra.mxu0 %v4943_v22  ;;  %v4975_v44 = vld [vmem:[#allocation2 + $0x184] ss:$16 sps:$4 sm:$0xff]   ;;  %v4979_v46 = vld [vmem:[#allocation2 + $0x180] ss:$16 sps:$4 sm:$0xff]  }
  0x3c   :  { %1540 = vmatpush1.bf16.msra.mxu1 %v4944_v23  ;;  %1498 = vmatprep.subr.bf16.mxu0 %v4945_v24  ;;  %v4977_v45 = vld [vmem:[#allocation2 + $0x384] ss:$16 sps:$4 sm:$0xff]   ;;  %v4980_v47 = vld [vmem:[#allocation2 + $0x380] ss:$16 sps:$4 sm:$0xff]  }
  0x3d   :  { %1541 = vmatprep.subr.bf16.mxu1 %v4947_v25  ;;  %v4981_v48 = vld [vmem:[#allocation2 + $0x164] ss:$16 sps:$4 sm:$0xff]   ;;  %v4985_v52 = vld [vmem:[#allocation2 + $0x160] ss:$16 sps:$4 sm:$0xff]  }
  0x3e   :  { %v5792_v49 = vld [vmem:[%s6142_s0 + $0x4] ss:$28 sps:$4 sm:$0xff]  }
  0x3f   :  { %1499 = vmatpush1.bf16.msra.mxu0 %v4949_v26  ;;  %v4983_v50 = vld [vmem:[#allocation2 + $0x364] ss:$16 sps:$4 sm:$0xff]   ;;  %1518 = vmatprep.mubr.bf16.mxu0 %v5792_v49  ;;  %v4986_v53 = vld [vmem:[#allocation2 + $0x360] ss:$16 sps:$4 sm:$0xff]  }
  0x40   :  { %1542 = vmatpush1.bf16.msra.mxu1 %v4950_v27  ;;  %1500 = vmatprep.subr.bf16.mxu0 %v4951_v28  ;;  %v4987_v54 = vld [vmem:[#allocation2 + $0x144] ss:$16 sps:$4 sm:$0xff]   ;;  %v4991_v56 = vld [vmem:[#allocation2 + $0x140] ss:$16 sps:$4 sm:$0xff]  }
  0x41   :  { %1543 = vmatprep.subr.bf16.mxu1 %v4953_v29  ;;  %v4989_v55 = vld [vmem:[#allocation2 + $0x344] ss:$16 sps:$4 sm:$0xff]   ;;  %v4992_v57 = vld [vmem:[#allocation2 + $0x340] ss:$16 sps:$4 sm:$0xff]  }
  0x42   :  { %v4993_v58 = vld [vmem:[#allocation2 + $0x124] ss:$16 sps:$4 sm:$0xff]   ;;  %v4997_v60 = vld [vmem:[#allocation2 + $0x120] ss:$16 sps:$4 sm:$0xff]  }
  0x43   :  { %1501 = vmatpush1.bf16.msra.mxu0 %v4955_v30  ;;  %v4995_v59 = vld [vmem:[#allocation2 + $0x324] ss:$16 sps:$4 sm:$0xff]   ;;  %v4998_v61 = vld [vmem:[#allocation2 + $0x320] ss:$16 sps:$4 sm:$0xff]  }
  0x44   :  { %1544 = vmatpush1.bf16.msra.mxu1 %v4956_v31  ;;  %1502 = vmatprep.subr.bf16.mxu0 %v4957_v32  ;;  %v4999_v62 = vld [vmem:[#allocation2 + $0x104] ss:$16 sps:$4 sm:$0xff]   ;;  %v5003_v0 = vld [vmem:[#allocation2 + $0x100] ss:$16 sps:$4 sm:$0xff]  }
  0x45   :  { %1545 = vmatprep.subr.bf16.mxu1 %v4959_v33  ;;  %v5001_v63 = vld [vmem:[#allocation2 + $0x304] ss:$16 sps:$4 sm:$0xff]   ;;  %v5004_v1 = vld [vmem:[#allocation2 + $0x300] ss:$16 sps:$4 sm:$0xff]  }
  0x46   :  { %v5013_v2 = vld [vmem:[#allocation2 + $0x4e4] ss:$16 sps:$4 sm:$0xff]   ;;  %v5804_v4 = vld [vmem:[%s6142_s0] ss:$28 sps:$4 sm:$0xff]  }
  0x47   :  { %1503 = vmatpush2.bf16.msra.mxu0 %v4961_v34  ;;  %v5016_v3 = vld [vmem:[#allocation2 + $0x6e4] ss:$16 sps:$4 sm:$0xff]   ;;  %v5011_v6 = vld [vmem:[#allocation2 + $0x4e0] ss:$16 sps:$4 sm:$0xff]  }
  0x48   :  { %1546 = vmatpush2.bf16.msra.mxu1 %v4962_v35  ;;  %1504 = vmatprep.subr.bf16.mxu0 %v4963_v36  ;;  %v5008_v5 = vld [vmem:[%s6142_s0 + $0x8] ss:$28 sps:$4 sm:$0xff]   ;;  %v5014_v7 = vld [vmem:[#allocation2 + $0x6e0] ss:$16 sps:$4 sm:$0xff]  }
  0x49   :  { %1547 = vmatprep.subr.bf16.mxu1 %v4965_v37  ;;  %v5019_v8 = vld [vmem:[#allocation2 + $0x4c4] ss:$16 sps:$4 sm:$0xff]   ;;  %v5017_v10 = vld [vmem:[#allocation2 + $0x4c0] ss:$16 sps:$4 sm:$0xff]  }
  0x4a   :  { %v5022_v9 = vld [vmem:[#allocation2 + $0x6c4] ss:$16 sps:$4 sm:$0xff]   ;;  %v5020_v11 = vld [vmem:[#allocation2 + $0x6c0] ss:$16 sps:$4 sm:$0xff]  }
  0x4b   :  { %1505 = vmatpush2.bf16.msra.mxu0 %v4967_v38  ;;  %v5025_v12 = vld [vmem:[#allocation2 + $0x4a4] ss:$16 sps:$4 sm:$0xff]   ;;  %v5023_v15 = vld [vmem:[#allocation2 + $0x4a0] ss:$16 sps:$4 sm:$0xff]  }
  0x4c   :  { %1548 = vmatpush2.bf16.msra.mxu1 %v4968_v39  ;;  %1506 = vmatprep.subr.bf16.mxu0 %v4969_v40  ;;  %v5028_v13 = vld [vmem:[#allocation2 + $0x6a4] ss:$16 sps:$4 sm:$0xff]   ;;  %v5026_v16 = vld [vmem:[#allocation2 + $0x6a0] ss:$16 sps:$4 sm:$0xff]   ;;  %v5065_v39 = vld [vmem:[#allocation2 + $0xec] ss:$16 sps:$4 sm:$0xff]  }
  0x4d   :  { %1549 = vmatprep.subr.bf16.mxu1 %v4971_v41  ;;  %v5031_v17 = vld [vmem:[#allocation2 + $0x484] ss:$16 sps:$4 sm:$0xff]   ;;  %v5029_v19 = vld [vmem:[#allocation2 + $0x480] ss:$16 sps:$4 sm:$0xff]  }
  0x4e   :  { %v5034_v18 = vld [vmem:[#allocation2 + $0x684] ss:$16 sps:$4 sm:$0xff]   ;;  %v5032_v20 = vld [vmem:[#allocation2 + $0x680] ss:$16 sps:$4 sm:$0xff]  }
  0x4f   :  { %1507 = vmatpush2.bf16.msra.mxu0 %v4973_v42  ;;  %v5037_v21 = vld [vmem:[#allocation2 + $0x464] ss:$16 sps:$4 sm:$0xff]   ;;  %v5035_v23 = vld [vmem:[#allocation2 + $0x460] ss:$16 sps:$4 sm:$0xff]   ;;  %v5063_v42 = vld [vmem:[#allocation2 + $0xe8] ss:$16 sps:$4 sm:$0xff]  }
  0x50   :  { %1550 = vmatpush2.bf16.msra.mxu1 %v4974_v43  ;;  %1508 = vmatprep.subr.bf16.mxu0 %v4975_v44  ;;  %v5040_v22 = vld [vmem:[#allocation2 + $0x664] ss:$16 sps:$4 sm:$0xff]   ;;  %v5038_v24 = vld [vmem:[#allocation2 + $0x660] ss:$16 sps:$4 sm:$0xff]   ;;  %v5071_v44 = vld [vmem:[#allocation2 + $0xcc] ss:$16 sps:$4 sm:$0xff]  }
  0x51   :  { %1551 = vmatprep.subr.bf16.mxu1 %v4977_v45  ;;  %v5043_v25 = vld [vmem:[#allocation2 + $0x444] ss:$16 sps:$4 sm:$0xff]   ;;  %v5041_v27 = vld [vmem:[#allocation2 + $0x440] ss:$16 sps:$4 sm:$0xff]  }
  0x52   :  { %v5046_v26 = vld [vmem:[#allocation2 + $0x644] ss:$16 sps:$4 sm:$0xff]   ;;  %v5044_v28 = vld [vmem:[#allocation2 + $0x640] ss:$16 sps:$4 sm:$0xff]  }
  0x53   :  { %1509 = vmatpush2.bf16.msra.mxu0 %v4979_v46  ;;  %v5049_v29 = vld [vmem:[#allocation2 + $0x424] ss:$16 sps:$4 sm:$0xff]   ;;  %v5047_v31 = vld [vmem:[#allocation2 + $0x420] ss:$16 sps:$4 sm:$0xff]   ;;  %v5069_v46 = vld [vmem:[#allocation2 + $0xc8] ss:$16 sps:$4 sm:$0xff]  }
  0x54   :  { %1552 = vmatpush2.bf16.msra.mxu1 %v4980_v47  ;;  %1510 = vmatprep.subr.bf16.mxu0 %v4981_v48  ;;  %v5052_v30 = vld [vmem:[#allocation2 + $0x624] ss:$16 sps:$4 sm:$0xff]   ;;  %v5050_v32 = vld [vmem:[#allocation2 + $0x620] ss:$16 sps:$4 sm:$0xff]   ;;  %v5077_v48 = vld [vmem:[#allocation2 + $0xac] ss:$16 sps:$4 sm:$0xff]  }
  0x55   :  { %1553 = vmatprep.subr.bf16.mxu1 %v4983_v50  ;;  %v5055_v33 = vld [vmem:[#allocation2 + $0x404] ss:$16 sps:$4 sm:$0xff]   ;;  %v5053_v36 = vld [vmem:[#allocation2 + $0x400] ss:$16 sps:$4 sm:$0xff]  }
  0x56   :  { %v5058_v34 = vld [vmem:[#allocation2 + $0x604] ss:$16 sps:$4 sm:$0xff]   ;;  %v5056_v37 = vld [vmem:[#allocation2 + $0x600] ss:$16 sps:$4 sm:$0xff]  }
  0x57   :  { %1511 = vmatpush2.bf16.msra.mxu0 %v4985_v52  ;;  %v5814_v35 = vld [vmem:[%s6142_s0 + $0x14] ss:$28 sps:$4 sm:$0xff]   ;;  %v5075_v52 = vld [vmem:[#allocation2 + $0xa8] ss:$16 sps:$4 sm:$0xff]  }
  0x58   :  { %1554 = vmatpush2.bf16.msra.mxu1 %v4986_v53  ;;  %1512 = vmatprep.subr.bf16.mxu0 %v4987_v54  ;;  %v5061_v38 = vld [vmem:[#allocation2 + $0x5e4] ss:$16 sps:$4 sm:$0xff]   ;;  %v5059_v40 = vld [vmem:[#allocation2 + $0x5e0] ss:$16 sps:$4 sm:$0xff]   ;;  %v5083_v54 = vld [vmem:[#allocation2 + $0x8c] ss:$16 sps:$4 sm:$0xff]  }
  0x59   :  { %1555 = vmatprep.subr.bf16.mxu1 %v4989_v55  ;;  %v5062_v41 = vld [vmem:[%s6142_s0 + $0x18] ss:$28 sps:$4 sm:$0xff]   ;;  %v5066_v45 = vld [vmem:[#allocation2 + $0x5c0] ss:$16 sps:$4 sm:$0xff]  }
  0x5a   :  { %v5068_v43 = vld [vmem:[#allocation2 + $0x5c4] ss:$16 sps:$4 sm:$0xff]   ;;  %v5072_v50 = vld [vmem:[#allocation2 + $0x5a0] ss:$16 sps:$4 sm:$0xff]  }
  0x5b   :  { %1513 = vmatpush2.bf16.msra.mxu0 %v4991_v56  ;;  %v5074_v47 = vld [vmem:[#allocation2 + $0x5a4] ss:$16 sps:$4 sm:$0xff]   ;;  %v5078_v55 = vld [vmem:[#allocation2 + $0x580] ss:$16 sps:$4 sm:$0xff]   ;;  %v5081_v56 = vld [vmem:[#allocation2 + $0x88] ss:$16 sps:$4 sm:$0xff]  }
  0x5c   :  { %1556 = vmatpush2.bf16.msra.mxu1 %v4992_v57  ;;  %1514 = vmatprep.subr.bf16.mxu0 %v4993_v58  ;;  %v5080_v53 = vld [vmem:[#allocation2 + $0x584] ss:$16 sps:$4 sm:$0xff]   ;;  %v5089_v58 = vld [vmem:[#allocation2 + $0x6c] ss:$16 sps:$4 sm:$0xff]  }
  0x5d   :  { %1557 = vmatprep.subr.bf16.mxu1 %v4995_v59  ;;  %v5086_v57 = vld [vmem:[#allocation2 + $0x564] ss:$16 sps:$4 sm:$0xff]   ;;  %v5084_v59 = vld [vmem:[#allocation2 + $0x560] ss:$16 sps:$4 sm:$0xff]  }
  0x5f   :  { %1515 = vmatpush2.bf16.msra.mxu0 %v4997_v60  ;;  %v5092_v60 = vld [vmem:[#allocation2 + $0x544] ss:$16 sps:$4 sm:$0xff]  }
  0x60   :  { %1558 = vmatpush2.bf16.msra.mxu1 %v4998_v61  ;;  %1516 = vmatprep.subr.bf16.mxu0 %v4999_v62  ;;  %v5095_v61 = vld [vmem:[#allocation2 + $0x4c] ss:$16 sps:$4 sm:$0xff]   ;;  %v5090_v62 = vld [vmem:[#allocation2 + $0x540] ss:$16 sps:$4 sm:$0xff]  }
  0x61   :  { %1559 = vmatprep.subr.bf16.mxu1 %v5001_v63  ;;  %v5093_v63 = vld [vmem:[#allocation2 + $0x48] ss:$16 sps:$4 sm:$0xff]  }
  0x63   :  { %1517 = vmatpush2.bf16.msra.mxu0 %v5003_v0  ;;  %v5098_v0 = vld [vmem:[#allocation2 + $0x524] ss:$16 sps:$4 sm:$0xff]  }
  0x64   :  { %1560 = vmatpush2.bf16.msra.mxu1 %v5004_v1  ;;  %1572 = vmatprep.subr.bf16.mxu0 %v5013_v2  ;;  %v5101_v1 = vld [vmem:[#allocation2 + $0x2c] ss:$16 sps:$4 sm:$0xff]   ;;  %v5096_v2 = vld [vmem:[#allocation2 + $0x520] ss:$16 sps:$4 sm:$0xff]  }
  0x65   :  { %1615 = vmatprep.subr.bf16.mxu1 %v5016_v3  ;;  %v5099_v3 = vld [vmem:[#allocation2 + $0x28] ss:$16 sps:$4 sm:$0xff]  }
  0x66   :  { %1519 = vmatmul.mubr.bf16.vlgmr.msra.gmra.mxu0 %v5804_v4 }
  0x67   :  { %1562 = vmatmul.mubr.bf16.vlgmr.msra.gmra.mxu1 %v5008_v5  ;;  %1573 = vmatpush1.bf16.msra.mxu0 %v5011_v6  ;;  %v5104_v5 = vld [vmem:[#allocation2 + $0x504] ss:$16 sps:$4 sm:$0xff]   ;;  %v5107_v6 = vld [vmem:[#allocation2 + $0xc] ss:$16 sps:$4 sm:$0xff]  }
  0x68   :  { %1616 = vmatpush1.bf16.msra.mxu1 %v5014_v7  ;;  %1574 = vmatprep.subr.bf16.mxu0 %v5019_v8  ;;  %v5102_v7 = vld [vmem:[#allocation2 + $0x500] ss:$16 sps:$4 sm:$0xff]   ;;  %v5105_v8 = vld [vmem:[#allocation2 + $0x8] ss:$16 sps:$4 sm:$0xff]  }
  0x69   :  { %1617 = vmatprep.subr.bf16.mxu1 %v5022_v9  ;;  %1647 = vmatprep.mubr.bf16.mxu1 %v5724_v14  ;;  %v5113_v9 = vld [vmem:[#allocation2 + $0x1ec] ss:$16 sps:$4 sm:$0xff]  }
  0x6a   :  { %1604 = vmatprep.mubr.bf16.mxu0 %v5814_v35 }
  0x6b   :  { %1575 = vmatpush1.bf16.msra.mxu0 %v5017_v10  ;;  %v5116_v10 = vld [vmem:[#allocation2 + $0x2ec] ss:$16 sps:$4 sm:$0xff]  }
  0x6c   :  { %1618 = vmatpush1.bf16.msra.mxu1 %v5020_v11  ;;  %1576 = vmatprep.subr.bf16.mxu0 %v5025_v12  ;;  %v5824_v11 = vld [vmem:[%s6142_s0 + $0x10] ss:$28 sps:$4 sm:$0xff]   ;;  %v5111_v12 = vld [vmem:[#allocation2 + $0x1e8] ss:$16 sps:$4 sm:$0xff]  }
  0x6d   :  { %1619 = vmatprep.subr.bf16.mxu1 %v5028_v13  ;;  %v5114_v13 = vld [vmem:[#allocation2 + $0x2e8] ss:$16 sps:$4 sm:$0xff]  }
  0x6f   :  { %1577 = vmatpush1.bf16.msra.mxu0 %v5023_v15  ;;  %v5119_v15 = vld [vmem:[#allocation2 + $0x1cc] ss:$16 sps:$4 sm:$0xff]  }
  0x70   :  { %1620 = vmatpush1.bf16.msra.mxu1 %v5026_v16  ;;  %1578 = vmatprep.subr.bf16.mxu0 %v5031_v17  ;;  %v5122_v16 = vld [vmem:[#allocation2 + $0x2cc] ss:$16 sps:$4 sm:$0xff]   ;;  %v5117_v17 = vld [vmem:[#allocation2 + $0x1c8] ss:$16 sps:$4 sm:$0xff]  }
  0x71   :  { %1621 = vmatprep.subr.bf16.mxu1 %v5034_v18  ;;  %v5120_v18 = vld [vmem:[#allocation2 + $0x2c8] ss:$16 sps:$4 sm:$0xff]  }
  0x73   :  { %1579 = vmatpush1.bf16.msra.mxu0 %v5029_v19  ;;  %v5125_v19 = vld [vmem:[#allocation2 + $0x1ac] ss:$16 sps:$4 sm:$0xff]  }
  0x74   :  { %1622 = vmatpush1.bf16.msra.mxu1 %v5032_v20  ;;  %1580 = vmatprep.subr.bf16.mxu0 %v5037_v21  ;;  %v5128_v20 = vld [vmem:[#allocation2 + $0x2ac] ss:$16 sps:$4 sm:$0xff]   ;;  %v5123_v21 = vld [vmem:[#allocation2 + $0x1a8] ss:$16 sps:$4 sm:$0xff]  }
  0x75   :  { %1623 = vmatprep.subr.bf16.mxu1 %v5040_v22  ;;  %v5126_v22 = vld [vmem:[#allocation2 + $0x2a8] ss:$16 sps:$4 sm:$0xff]  }
  0x77   :  { %1581 = vmatpush1.bf16.msra.mxu0 %v5035_v23  ;;  %v5131_v23 = vld [vmem:[#allocation2 + $0x18c] ss:$16 sps:$4 sm:$0xff]  }
  0x78   :  { %1624 = vmatpush1.bf16.msra.mxu1 %v5038_v24  ;;  %1582 = vmatprep.subr.bf16.mxu0 %v5043_v25  ;;  %v5134_v24 = vld [vmem:[#allocation2 + $0x28c] ss:$16 sps:$4 sm:$0xff]   ;;  %v5129_v25 = vld [vmem:[#allocation2 + $0x188] ss:$16 sps:$4 sm:$0xff]  }
  0x79   :  { %1625 = vmatprep.subr.bf16.mxu1 %v5046_v26  ;;  %v5132_v26 = vld [vmem:[#allocation2 + $0x288] ss:$16 sps:$4 sm:$0xff]  }
  0x7b   :  { %1583 = vmatpush1.bf16.msra.mxu0 %v5041_v27  ;;  %v5137_v27 = vld [vmem:[#allocation2 + $0x16c] ss:$16 sps:$4 sm:$0xff]  }
  0x7c   :  { %1626 = vmatpush1.bf16.msra.mxu1 %v5044_v28  ;;  %1584 = vmatprep.subr.bf16.mxu0 %v5049_v29  ;;  %v5140_v28 = vld [vmem:[#allocation2 + $0x26c] ss:$16 sps:$4 sm:$0xff]   ;;  %v5135_v29 = vld [vmem:[#allocation2 + $0x168] ss:$16 sps:$4 sm:$0xff]  }
  0x7d   :  { %1627 = vmatprep.subr.bf16.mxu1 %v5052_v30  ;;  %v5143_v30 = vld [vmem:[#allocation2 + $0x14c] ss:$16 sps:$4 sm:$0xff]  }
  0x7f   :  { %1585 = vmatpush1.bf16.msra.mxu0 %v5047_v31  ;;  %v5146_v31 = vld [vmem:[#allocation2 + $0x24c] ss:$16 sps:$4 sm:$0xff]  }
  0x80   :  { %1628 = vmatpush1.bf16.msra.mxu1 %v5050_v32  ;;  %1586 = vmatprep.subr.bf16.mxu0 %v5055_v33  ;;  %v5141_v32 = vld [vmem:[#allocation2 + $0x148] ss:$16 sps:$4 sm:$0xff]  }
  0x81   :  { %1629 = vmatprep.subr.bf16.mxu1 %v5058_v34  ;;  %v5144_v33 = vld [vmem:[#allocation2 + $0x248] ss:$16 sps:$4 sm:$0xff]   ;;  %v5149_v34 = vld [vmem:[#allocation2 + $0x12c] ss:$16 sps:$4 sm:$0xff]  }
  0x83   :  { %1587 = vmatpush1.bf16.msra.mxu0 %v5053_v36  ;;  %v5152_v36 = vld [vmem:[#allocation2 + $0x22c] ss:$16 sps:$4 sm:$0xff]  }
  0x84   :  { %1630 = vmatpush1.bf16.msra.mxu1 %v5056_v37  ;;  %1588 = vmatprep.subr.bf16.mxu0 %v5061_v38  ;;  %v5147_v37 = vld [vmem:[#allocation2 + $0x128] ss:$16 sps:$4 sm:$0xff]  }
  0x85   :  { %1658 = vmatprep.subr.bf16.mxu1 %v5065_v39  ;;  %v5150_v38 = vld [vmem:[#allocation2 + $0x228] ss:$16 sps:$4 sm:$0xff]   ;;  %v5155_v39 = vld [vmem:[#allocation2 + $0x10c] ss:$16 sps:$4 sm:$0xff]  }
  0x87   :  { %1648 = vmatmul.mubr.bf16.vlgmr.msra.gmra.mxu1 %v5062_v41  ;;  %1589 = vmatpush2.bf16.msra.mxu0 %v5059_v40  ;;  %v5158_v40 = vld [vmem:[#allocation2 + $0x20c] ss:$16 sps:$4 sm:$0xff]   ;;  %v5153_v41 = vld [vmem:[#allocation2 + $0x108] ss:$16 sps:$4 sm:$0xff]  }
  0x88   :  { %1659 = vmatpush1.bf16.msra.mxu1 %v5063_v42  ;;  %1590 = vmatprep.subr.bf16.mxu0 %v5068_v43  ;;  %v5156_v42 = vld [vmem:[#allocation2 + $0x208] ss:$16 sps:$4 sm:$0xff]   ;;  %v5161_v43 = vld [vmem:[#allocation2 + $0x3ec] ss:$16 sps:$4 sm:$0xff]  }
  0x89   :  { %1660 = vmatprep.subr.bf16.mxu1 %v5071_v44  ;;  %1690 = vmatprep.mubr.bf16.mxu1 %v5792_v49  ;;  %v5087_v49 = vld [vmem:[#allocation2 + $0x68] ss:$16 sps:$4 sm:$0xff]   ;;  %v5164_v44 = vld [vmem:[#allocation2 + $0x4ec] ss:$16 sps:$4 sm:$0xff]  }
  0x8b   :  { %1591 = vmatpush2.bf16.msra.mxu0 %v5066_v45  ;;  %v5159_v45 = vld [vmem:[#allocation2 + $0x3e8] ss:$16 sps:$4 sm:$0xff]  }
  0x8c   :  { %1661 = vmatpush1.bf16.msra.mxu1 %v5069_v46  ;;  %1592 = vmatprep.subr.bf16.mxu0 %v5074_v47  ;;  %v5162_v46 = vld [vmem:[#allocation2 + $0x4e8] ss:$16 sps:$4 sm:$0xff]   ;;  %v5167_v47 = vld [vmem:[#allocation2 + $0x3cc] ss:$16 sps:$4 sm:$0xff]  }
  0x8d   :  { %1662 = vmatprep.subr.bf16.mxu1 %v5077_v48  ;;  %v5170_v48 = vld [vmem:[#allocation2 + $0x4cc] ss:$16 sps:$4 sm:$0xff]  }
  0x8f   :  { %1593 = vmatpush2.bf16.msra.mxu0 %v5072_v50  ;;  %v5165_v50 = vld [vmem:[#allocation2 + $0x3c8] ss:$16 sps:$4 sm:$0xff]  }
  0x90   :  { %1663 = vmatpush1.bf16.msra.mxu1 %v5075_v52  ;;  %1594 = vmatprep.subr.bf16.mxu0 %v5080_v53  ;;  %v5168_v52 = vld [vmem:[#allocation2 + $0x4c8] ss:$16 sps:$4 sm:$0xff]   ;;  %v5173_v53 = vld [vmem:[#allocation2 + $0x3ac] ss:$16 sps:$4 sm:$0xff]  }
  0x91   :  { %1664 = vmatprep.subr.bf16.mxu1 %v5083_v54  ;;  %v5176_v54 = vld [vmem:[#allocation2 + $0x4ac] ss:$16 sps:$4 sm:$0xff]  }
  0x93   :  { %1595 = vmatpush2.bf16.msra.mxu0 %v5078_v55  ;;  %v5171_v55 = vld [vmem:[#allocation2 + $0x3a8] ss:$16 sps:$4 sm:$0xff]  }
  0x94   :  { %1665 = vmatpush1.bf16.msra.mxu1 %v5081_v56  ;;  %1596 = vmatprep.subr.bf16.mxu0 %v5086_v57  ;;  %v5174_v56 = vld [vmem:[#allocation2 + $0x4a8] ss:$16 sps:$4 sm:$0xff]   ;;  %v5179_v57 = vld [vmem:[#allocation2 + $0x38c] ss:$16 sps:$4 sm:$0xff]  }
  0x95   :  { %1666 = vmatprep.subr.bf16.mxu1 %v5089_v58  ;;  %v5182_v58 = vld [vmem:[#allocation2 + $0x48c] ss:$16 sps:$4 sm:$0xff]  }
  0x97   :  { %1597 = vmatpush2.bf16.msra.mxu0 %v5084_v59  ;;  %v5177_v59 = vld [vmem:[#allocation2 + $0x388] ss:$16 sps:$4 sm:$0xff]  }
  0x98   :  { %1667 = vmatpush1.bf16.msra.mxu1 %v5087_v49  ;;  %1598 = vmatprep.subr.bf16.mxu0 %v5092_v60  ;;  %v5185_v49 = vld [vmem:[#allocation2 + $0x36c] ss:$16 sps:$4 sm:$0xff]  }
  0x99   :  { %1668 = vmatprep.subr.bf16.mxu1 %v5095_v61  ;;  %v5188_v60 = vld [vmem:[#allocation2 + $0x46c] ss:$16 sps:$4 sm:$0xff]   ;;  %v5183_v61 = vld [vmem:[#allocation2 + $0x368] ss:$16 sps:$4 sm:$0xff]  }
  0x9b   :  { %1599 = vmatpush2.bf16.msra.mxu0 %v5090_v62  ;;  %v5186_v62 = vld [vmem:[#allocation2 + $0x468] ss:$16 sps:$4 sm:$0xff]  }
  0x9c   :  { %1669 = vmatpush1.bf16.msra.mxu1 %v5093_v63  ;;  %1600 = vmatprep.subr.bf16.mxu0 %v5098_v0  ;;  %v5191_v63 = vld [vmem:[#allocation2 + $0x34c] ss:$16 sps:$4 sm:$0xff]   ;;  %v5189_v0 = vld [vmem:[#allocation2 + $0x348] ss:$16 sps:$4 sm:$0xff]  }
  0x9d   :  { %1670 = vmatprep.subr.bf16.mxu1 %v5101_v1  ;;  %v5192_v1 = vld [vmem:[#allocation2 + $0x448] ss:$16 sps:$4 sm:$0xff]  }
  0x9f   :  { %1601 = vmatpush2.bf16.msra.mxu0 %v5096_v2  ;;  %v5197_v2 = vld [vmem:[#allocation2 + $0x32c] ss:$16 sps:$4 sm:$0xff]  }
  0xa0   :  { %1671 = vmatpush1.bf16.msra.mxu1 %v5099_v3  ;;  %1602 = vmatprep.subr.bf16.mxu0 %v5104_v5  ;;  %v5200_v3 = vld [vmem:[#allocation2 + $0x42c] ss:$16 sps:$4 sm:$0xff]   ;;  %v5195_v5 = vld [vmem:[#allocation2 + $0x328] ss:$16 sps:$4 sm:$0xff]  }
  0xa1   :  { %1672 = vmatprep.subr.bf16.mxu1 %v5107_v6  ;;  %v5198_v6 = vld [vmem:[#allocation2 + $0x428] ss:$16 sps:$4 sm:$0xff]  }
  0xa3   :  { %1603 = vmatpush2.bf16.msra.mxu0 %v5102_v7  ;;  %v5203_v7 = vld [vmem:[#allocation2 + $0x30c] ss:$16 sps:$4 sm:$0xff]  }
  0xa4   :  { %1673 = vmatpush1.bf16.msra.mxu1 %v5105_v8  ;;  %1701 = vmatprep.subr.bf16.mxu0 %v5116_v10  ;;  %v5206_v8 = vld [vmem:[#allocation2 + $0x40c] ss:$16 sps:$4 sm:$0xff]   ;;  %v5204_v10 = vld [vmem:[#allocation2 + $0x408] ss:$16 sps:$4 sm:$0xff]  }
  0xa5   :  { %1674 = vmatprep.subr.bf16.mxu1 %v5113_v9  ;;  %v5201_v9 = vld [vmem:[#allocation2 + $0x308] ss:$16 sps:$4 sm:$0xff]  }
  0xa6   :  { %1605 = vmatmul.mubr.bf16.vlgmr.msra.gmra.mxu0 %v5824_v11 }
  0xa7   :  { %1702 = vmatpush1.bf16.msra.mxu0 %v5114_v13  ;;  %1733 = vmatprep.mubr.bf16.mxu0 %v5797_v51  ;;  %v5138_v51 = vld [vmem:[#allocation2 + $0x268] ss:$16 sps:$4 sm:$0xff]   ;;  %v5212_v13 = vld [vmem:[#allocation2 + $0x6ec] ss:$16 sps:$4 sm:$0xff]  }
  0xa8   :  { %1675 = vmatpush2.bf16.msra.mxu1 %v5111_v12  ;;  %1703 = vmatprep.subr.bf16.mxu0 %v5122_v16  ;;  %v5209_v12 = vld [vmem:[#allocation2 + $0x5ec] ss:$16 sps:$4 sm:$0xff]   ;;  %v5210_v16 = vld [vmem:[#allocation2 + $0x6e8] ss:$16 sps:$4 sm:$0xff]  }
  0xa9   :  { %1676 = vmatprep.subr.bf16.mxu1 %v5119_v15  ;;  %v5207_v15 = vld [vmem:[#allocation2 + $0x5e8] ss:$16 sps:$4 sm:$0xff]  }
  0xab   :  { %1704 = vmatpush1.bf16.msra.mxu0 %v5120_v18  ;;  %v5218_v18 = vld [vmem:[#allocation2 + $0x6cc] ss:$16 sps:$4 sm:$0xff]  }
  0xac   :  { %1677 = vmatpush2.bf16.msra.mxu1 %v5117_v17  ;;  %1705 = vmatprep.subr.bf16.mxu0 %v5128_v20  ;;  %v5215_v17 = vld [vmem:[#allocation2 + $0x5cc] ss:$16 sps:$4 sm:$0xff]   ;;  %v5651_v20 = vld [vmem:[%s6142_s0 + $0x8] ss:$28 sps:$4 sm:$0xff]  }
  0xad   :  { %1678 = vmatprep.subr.bf16.mxu1 %v5125_v19  ;;  %v5213_v19 = vld [vmem:[#allocation2 + $0x5c8] ss:$16 sps:$4 sm:$0xff]  }
  0xaf   :  { %1706 = vmatpush1.bf16.msra.mxu0 %v5126_v22  ;;  %v5221_v22 = vld [vmem:[#allocation2 + $0x5ac] ss:$16 sps:$4 sm:$0xff]  }
  0xb0   :  { %1679 = vmatpush2.bf16.msra.mxu1 %v5123_v21  ;;  %1707 = vmatprep.subr.bf16.mxu0 %v5134_v24  ;;  %v5216_v21 = vld [vmem:[#allocation2 + $0x6c8] ss:$16 sps:$4 sm:$0xff]  }
  0xb1   :  { %1680 = vmatprep.subr.bf16.mxu1 %v5131_v23  ;;  %v5224_v23 = vld [vmem:[#allocation2 + $0x6ac] ss:$16 sps:$4 sm:$0xff]   ;;  %v5219_v24 = vld [vmem:[#allocation2 + $0x5a8] ss:$16 sps:$4 sm:$0xff]  }
  0xb3   :  { %1708 = vmatpush1.bf16.msra.mxu0 %v5132_v26  ;;  %v5227_v26 = vld [vmem:[#allocation2 + $0x58c] ss:$16 sps:$4 sm:$0xff]  }
  0xb4   :  { %1681 = vmatpush2.bf16.msra.mxu1 %v5129_v25  ;;  %1709 = vmatprep.subr.bf16.mxu0 %v5140_v28  ;;  %v5222_v25 = vld [vmem:[#allocation2 + $0x6a8] ss:$16 sps:$4 sm:$0xff]  }
  0xb5   :  { %1682 = vmatprep.subr.bf16.mxu1 %v5137_v27  ;;  %v5230_v27 = vld [vmem:[#allocation2 + $0x68c] ss:$16 sps:$4 sm:$0xff]   ;;  %v5225_v28 = vld [vmem:[#allocation2 + $0x588] ss:$16 sps:$4 sm:$0xff]  }
  0xb7   :  { %1710 = vmatpush1.bf16.msra.mxu0 %v5138_v51  ;;  %v5233_v51 = vld [vmem:[#allocation2 + $0x56c] ss:$16 sps:$4 sm:$0xff]  }
  0xb8   :  { %1683 = vmatpush2.bf16.msra.mxu1 %v5135_v29  ;;  %1711 = vmatprep.subr.bf16.mxu0 %v5146_v31  ;;  %v5228_v29 = vld [vmem:[#allocation2 + $0x688] ss:$16 sps:$4 sm:$0xff]  }
  0xb9   :  { %1684 = vmatprep.subr.bf16.mxu1 %v5143_v30  ;;  %v5236_v30 = vld [vmem:[#allocation2 + $0x66c] ss:$16 sps:$4 sm:$0xff]   ;;  %v5231_v31 = vld [vmem:[#allocation2 + $0x568] ss:$16 sps:$4 sm:$0xff]  }
  0xbb   :  { %1712 = vmatpush1.bf16.msra.mxu0 %v5144_v33  ;;  %v5239_v33 = vld [vmem:[#allocation2 + $0x54c] ss:$16 sps:$4 sm:$0xff]  }
  0xbc   :  { %1685 = vmatpush2.bf16.msra.mxu1 %v5141_v32  ;;  %1713 = vmatprep.subr.bf16.mxu0 %v5152_v36  ;;  %v5234_v32 = vld [vmem:[#allocation2 + $0x668] ss:$16 sps:$4 sm:$0xff]  }
  0xbd   :  { %1686 = vmatprep.subr.bf16.mxu1 %v5149_v34  ;;  %v5242_v34 = vld [vmem:[#allocation2 + $0x64c] ss:$16 sps:$4 sm:$0xff]   ;;  %v5237_v36 = vld [vmem:[#allocation2 + $0x548] ss:$16 sps:$4 sm:$0xff]  }
  0xbf   :  { %1714 = vmatpush1.bf16.msra.mxu0 %v5150_v38  ;;  %v5245_v38 = vld [vmem:[#allocation2 + $0x52c] ss:$16 sps:$4 sm:$0xff]  }
  0xc0   :  { %1687 = vmatpush2.bf16.msra.mxu1 %v5147_v37  ;;  %1715 = vmatprep.subr.bf16.mxu0 %v5158_v40  ;;  %v5240_v37 = vld [vmem:[#allocation2 + $0x648] ss:$16 sps:$4 sm:$0xff]  }
  0xc1   :  { %1688 = vmatprep.subr.bf16.mxu1 %v5155_v39  ;;  %v5248_v39 = vld [vmem:[#allocation2 + $0x62c] ss:$16 sps:$4 sm:$0xff]   ;;  %v5243_v40 = vld [vmem:[#allocation2 + $0x528] ss:$16 sps:$4 sm:$0xff]  }
  0xc3   :  { %1716 = vmatpush1.bf16.msra.mxu0 %v5156_v42  ;;  %v5251_v42 = vld [vmem:[#allocation2 + $0x50c] ss:$16 sps:$4 sm:$0xff]  }
  0xc4   :  { %1689 = vmatpush2.bf16.msra.mxu1 %v5153_v41  ;;  %1717 = vmatprep.subr.bf16.mxu0 %v5161_v43  ;;  %v5246_v41 = vld [vmem:[#allocation2 + $0x628] ss:$16 sps:$4 sm:$0xff]   ;;  %v5254_v43 = vld [vmem:[#allocation2 + $0x60c] ss:$16 sps:$4 sm:$0xff]  }
  0xc5   :  { %1744 = vmatprep.subr.bf16.mxu1 %v5164_v44  ;;  %v5249_v44 = vld [vmem:[#allocation2 + $0x508] ss:$16 sps:$4 sm:$0xff]  }
  0xc7   :  { %1691 = vmatmul.mubr.bf16.vlgmr.msra.gmra.mxu1 %v5804_v4  ;;  %1718 = vmatpush2.bf16.msra.mxu0 %v5159_v45  ;;  %v5180_v4 = vld [vmem:[#allocation2 + $0x488] ss:$16 sps:$4 sm:$0xff]  }
  0xc8   :  { %1745 = vmatpush1.bf16.msra.mxu1 %v5162_v46  ;;  %1719 = vmatprep.subr.bf16.mxu0 %v5167_v47  ;;  %v5252_v45 = vld [vmem:[#allocation2 + $0x608] ss:$16 sps:$4 sm:$0xff]  }
  0xc9   :  { %1746 = vmatprep.subr.bf16.mxu1 %v5170_v48  ;;  %1776 = vmatprep.mubr.bf16.mxu1 %v5814_v35  ;;  %v5194_v35 = vld [vmem:[#allocation2 + $0x44c] ss:$16 sps:$4 sm:$0xff]   ;;  %v1868_v48 = vld [vmem:[%s6145_s3 + $0xf0] sm:$0xff] }
  0xca   :  { %v1869_v46 = vld [vmem:[%s6145_s3 + $0xf8] sm:$0xff] }
  0xcb   :  { %1720 = vmatpush2.bf16.msra.mxu0 %v5165_v50  ;;  %v1853_v47 = vld [vmem:[%s6145_s3 + $0x78] sm:$0xff]  ;;  %v1852_v50 = vld [vmem:[%s6145_s3 + $0x70] sm:$0xff] }
  0xcc   :  { %1747 = vmatpush1.bf16.msra.mxu1 %v5168_v52  ;;  %1721 = vmatprep.subr.bf16.mxu0 %v5173_v53  ;;  %v1867_v52 = vld [vmem:[%s6145_s3 + $0xe8] sm:$0xff]  ;;  %v5652_v53 = vld [vmem:[%s6142_s0 + $0x18] ss:$28 sps:$4 sm:$0xff]  }
  0xcd   :  { %1748 = vmatprep.subr.bf16.mxu1 %v5176_v54  ;;  %v1851_v54 = vld [vmem:[%s6145_s3 + $0x68] sm:$0xff] }
  0xcf   :  { %1722 = vmatpush2.bf16.msra.mxu0 %v5171_v55  ;;  %v1866_v55 = vld [vmem:[%s6145_s3 + $0xe0] sm:$0xff] }
  0xd0   :  { %1749 = vmatpush1.bf16.msra.mxu1 %v5174_v56  ;;  %1723 = vmatprep.subr.bf16.mxu0 %v5179_v57  ;;  %v1850_v56 = vld [vmem:[%s6145_s3 + $0x60] sm:$0xff]  ;;  %v1849_v57 = vld [vmem:[%s6145_s3 + $0x58] sm:$0xff] }
  0xd1   :  { %1750 = vmatprep.subr.bf16.mxu1 %v5182_v58  ;;  %v1864_v58 = vld [vmem:[%s6145_s3 + $0xd0] sm:$0xff] }
  0xd3   :  { %1724 = vmatpush2.bf16.msra.mxu0 %v5177_v59  ;;  %v1848_v59 = vld [vmem:[%s6145_s3 + $0x50] sm:$0xff] }
  0xd4   :  { %1751 = vmatpush1.bf16.msra.mxu1 %v5180_v4  ;;  %1725 = vmatprep.subr.bf16.mxu0 %v5185_v49  ;;  %v1863_v4 = vld [vmem:[%s6145_s3 + $0xc8] sm:$0xff] }
  0xd5   :  { %1752 = vmatprep.subr.bf16.mxu1 %v5188_v60  ;;  %v1847_v49 = vld [vmem:[%s6145_s3 + $0x48] sm:$0xff]  ;;  %v1862_v60 = vld [vmem:[%s6145_s3 + $0xc0] sm:$0xff] }
  0xd7   :  { %1726 = vmatpush2.bf16.msra.mxu0 %v5183_v61  ;;  %v1846_v61 = vld [vmem:[%s6145_s3 + $0x40] sm:$0xff] }
  0xd8   :  { %1753 = vmatpush1.bf16.msra.mxu1 %v5186_v62  ;;  %1727 = vmatprep.subr.bf16.mxu0 %v5191_v63  ;;  %v1861_v62 = vld [vmem:[%s6145_s3 + $0xb8] sm:$0xff] }
  0xd9   :  { %1754 = vmatprep.subr.bf16.mxu1 %v5194_v35  ;;  %v1845_v63 = vld [vmem:[%s6145_s3 + $0x38] sm:$0xff]  ;;  %v1860_v35 = vld [vmem:[%s6145_s3 + $0xb0] sm:$0xff] }
  0xdb   :  { %1728 = vmatpush2.bf16.msra.mxu0 %v5189_v0  ;;  %v1844_v0 = vld [vmem:[%s6145_s3 + $0x30] sm:$0xff] }
  0xdc   :  { %1755 = vmatpush1.bf16.msra.mxu1 %v5192_v1  ;;  %1729 = vmatprep.subr.bf16.mxu0 %v5197_v2  ;;  %v1859_v1 = vld [vmem:[%s6145_s3 + $0xa8] sm:$0xff] }
  0xdd   :  { %1756 = vmatprep.subr.bf16.mxu1 %v5200_v3  ;;  %v1843_v2 = vld [vmem:[%s6145_s3 + $0x28] sm:$0xff]  ;;  %v1858_v3 = vld [vmem:[%s6145_s3 + $0xa0] sm:$0xff] }
  0xdf   :  { %1730 = vmatpush2.bf16.msra.mxu0 %v5195_v5  ;;  %v1842_v5 = vld [vmem:[%s6145_s3 + $0x20] sm:$0xff] }
  0xe0   :  { %1757 = vmatpush1.bf16.msra.mxu1 %v5198_v6  ;;  %1731 = vmatprep.subr.bf16.mxu0 %v5203_v7  ;;  %v1857_v6 = vld [vmem:[%s6145_s3 + $0x98] sm:$0xff] }
  0xe1   :  { %1758 = vmatprep.subr.bf16.mxu1 %v5206_v8  ;;  %v1841_v7 = vld [vmem:[%s6145_s3 + $0x18] sm:$0xff]  ;;  %v1856_v8 = vld [vmem:[%s6145_s3 + $0x90] sm:$0xff] }
  0xe3   :  { %1732 = vmatpush2.bf16.msra.mxu0 %v5201_v9  ;;  %v1840_v9 = vld [vmem:[%s6145_s3 + $0x10] sm:$0xff] }
  0xe4   :  { %1759 = vmatpush1.bf16.msra.mxu1 %v5204_v10  ;;  %1787 = vmatprep.subr.bf16.mxu0 %v5212_v13  ;;  %v1855_v10 = vld [vmem:[%s6145_s3 + $0x88] sm:$0xff]  ;;  %v1854_v13 = vld [vmem:[%s6145_s3 + $0x80] sm:$0xff] }
  0xe5   :  { %1760 = vmatprep.subr.bf16.mxu1 %v5209_v12  ;;  %v1839_v12 = vld [vmem:[%s6145_s3 + $0x8] sm:$0xff] }
  0xe6   :  { %1734 = vmatmul.mubr.bf16.vlgmr.msra.gmra.mxu0 %v5651_v20  ;;  %v1899_v20 = vld [vmem:[%s6145_s3 + $0x1e8] sm:$0xff] }
  0xe7   :  { %1788 = vmatpush1.bf16.msra.mxu0 %v5210_v16  ;;  %1819 = vmatprep.mubr.bf16.mxu0 %v5724_v14  ;;  %v1901_v16 = vld [vmem:[%s6145_s3 + $0x1f8] sm:$0xff] }
  0xe8   :  { %1761 = vmatpush2.bf16.msra.mxu1 %v5207_v15  ;;  %1789 = vmatprep.subr.bf16.mxu0 %v5218_v18  ;;  %v1838_v15 = vld [vmem:[%s6145_s3] sm:$0xff]  ;;  %v1900_v18 = vld [vmem:[%s6145_s3 + $0x1f0] sm:$0xff] }
  0xe9   :  { %1762 = vmatprep.subr.bf16.mxu1 %v5215_v17  ;;  %v1885_v17 = vld [vmem:[%s6145_s3 + $0x178] sm:$0xff] }
  0xeb   :  { %1790 = vmatpush1.bf16.msra.mxu0 %v5216_v21  ;;  %v1883_v21 = vld [vmem:[%s6145_s3 + $0x168] sm:$0xff] }
  0xec   :  { %1763 = vmatpush2.bf16.msra.mxu1 %v5213_v19  ;;  %1791 = vmatprep.subr.bf16.mxu0 %v5224_v23  ;;  %v1884_v19 = vld [vmem:[%s6145_s3 + $0x170] sm:$0xff]  ;;  %v1882_v23 = vld [vmem:[%s6145_s3 + $0x160] sm:$0xff] }
  0xed   :  { %1764 = vmatprep.subr.bf16.mxu1 %v5221_v22  ;;  %v1898_v22 = vld [vmem:[%s6145_s3 + $0x1e0] sm:$0xff] }
  0xef   :  { %1792 = vmatpush1.bf16.msra.mxu0 %v5222_v25  ;;  %v1881_v25 = vld [vmem:[%s6145_s3 + $0x158] sm:$0xff] }
  0xf0   :  { %1765 = vmatpush2.bf16.msra.mxu1 %v5219_v24  ;;  %1793 = vmatprep.subr.bf16.mxu0 %v5230_v27  ;;  %v1897_v24 = vld [vmem:[%s6145_s3 + $0x1d8] sm:$0xff]  ;;  %v1880_v27 = vld [vmem:[%s6145_s3 + $0x150] sm:$0xff] }
  0xf1   :  { %1766 = vmatprep.subr.bf16.mxu1 %v5227_v26  ;;  %v1896_v26 = vld [vmem:[%s6145_s3 + $0x1d0] sm:$0xff] }
  0xf3   :  { %1794 = vmatpush1.bf16.msra.mxu0 %v5228_v29  ;;  %v1879_v29 = vld [vmem:[%s6145_s3 + $0x148] sm:$0xff] }
  0xf4   :  { %1767 = vmatpush2.bf16.msra.mxu1 %v5225_v28  ;;  %1795 = vmatprep.subr.bf16.mxu0 %v5236_v30  ;;  %v1895_v28 = vld [vmem:[%s6145_s3 + $0x1c8] sm:$0xff]  ;;  %v1878_v30 = vld [vmem:[%s6145_s3 + $0x140] sm:$0xff] }
  0xf5   :  { %1768 = vmatprep.subr.bf16.mxu1 %v5233_v51  ;;  %v1894_v51 = vld [vmem:[%s6145_s3 + $0x1c0] sm:$0xff] }
  0xf7   :  { %1796 = vmatpush1.bf16.msra.mxu0 %v5234_v32  ;;  %v1877_v32 = vld [vmem:[%s6145_s3 + $0x138] sm:$0xff] }
  0xf8   :  { %1769 = vmatpush2.bf16.msra.mxu1 %v5231_v31  ;;  %1797 = vmatprep.subr.bf16.mxu0 %v5242_v34  ;;  %v1893_v31 = vld [vmem:[%s6145_s3 + $0x1b8] sm:$0xff]  ;;  %v1876_v34 = vld [vmem:[%s6145_s3 + $0x130] sm:$0xff] }
  0xf9   :  { %1770 = vmatprep.subr.bf16.mxu1 %v5239_v33  ;;  %v1892_v33 = vld [vmem:[%s6145_s3 + $0x1b0] sm:$0xff] }
  0xfb   :  { %1798 = vmatpush1.bf16.msra.mxu0 %v5240_v37  ;;  %v1875_v37 = vld [vmem:[%s6145_s3 + $0x128] sm:$0xff] }
  0xfc   :  { %1771 = vmatpush2.bf16.msra.mxu1 %v5237_v36  ;;  %1799 = vmatprep.subr.bf16.mxu0 %v5248_v39  ;;  %v1891_v36 = vld [vmem:[%s6145_s3 + $0x1a8] sm:$0xff]  ;;  %v1874_v39 = vld [vmem:[%s6145_s3 + $0x120] sm:$0xff] }
  0xfd   :  { %1772 = vmatprep.subr.bf16.mxu1 %v5245_v38  ;;  %v1890_v38 = vld [vmem:[%s6145_s3 + $0x1a0] sm:$0xff] }
  0xff   :  { %1800 = vmatpush1.bf16.msra.mxu0 %v5246_v41  ;;  %v1873_v41 = vld [vmem:[%s6145_s3 + $0x118] sm:$0xff] }
 0x100   :  { %1773 = vmatpush2.bf16.msra.mxu1 %v5243_v40  ;;  %1801 = vmatprep.subr.bf16.mxu0 %v5254_v43  ;;  %v1889_v40 = vld [vmem:[%s6145_s3 + $0x198] sm:$0xff]  ;;  %v1872_v43 = vld [vmem:[%s6145_s3 + $0x110] sm:$0xff] }
 0x101   :  { %1774 = vmatprep.subr.bf16.mxu1 %v5251_v42  ;;  %v1888_v42 = vld [vmem:[%s6145_s3 + $0x190] sm:$0xff] }
 0x103   :  { %1802 = vmatpush1.bf16.msra.mxu0 %v5252_v45  ;;  %v1871_v45 = vld [vmem:[%s6145_s3 + $0x108] sm:$0xff] }
 0x104   :  { %1775 = vmatpush2.bf16.msra.mxu1 %v5249_v44  ;;  %4781 = vmatprep.subr.mxu0 %v1869_v46  ;;  %v1887_v44 = vld [vmem:[%s6145_s3 + $0x188] sm:$0xff]  ;;  %v1886_v46 = vld [vmem:[%s6145_s3 + $0x180] sm:$0xff] }
 0x105   :  { %4819 = vmatprep.subr.mxu1 %v1901_v16 }
 0x106   :  { %1820 = vmatmul.mubr.bf16.vlgmr.msra.gmra.mxu0 %v5652_v53 }
 0x107   :  { %1777 = vmatmul.mubr.bf16.vlgmr.msra.gmra.mxu1 %v5824_v11  ;;  %4782 = vmatpush3.msra.mxu0 %v1853_v47  ;;  %v1865_v11 = vld [vmem:[%s6145_s3 + $0xd8] sm:$0xff]  ;;  %v1870_v47 = vld [vmem:[%s6145_s3 + $0x100] sm:$0xff] }
 0x108   :  { %4783 = vmatprep.subr.mxu0 %v1868_v48  ;;  %4820 = vmatpush3.msra.mxu1 %v1885_v17  ;;  %v310_v48 = vlaneseq }
 0x109   :  { %4784 = vmatpush3.msra.mxu0 %v1852_v50  ;;  %4821 = vmatprep.subr.mxu1 %v1900_v18 }
 0x10a   :  { %4785 = vmatprep.subr.mxu0 %v1867_v52  ;;  %4822 = vmatpush3.msra.mxu1 %v1884_v19  ;;  %v6030_v52 = vshrl.u32 %v310_v48, 7 }
 0x10b   :  { %4786 = vmatpush3.msra.mxu0 %v1851_v54  ;;  %4823 = vmatprep.subr.mxu1 %v1899_v20 }
 0x10c   :  { %4787 = vmatprep.subr.mxu0 %v1866_v55  ;;  %4824 = vmatpush3.msra.mxu1 %v1883_v21  ;;  %v6033_v55 = vsub.s32 0, %v6030_v52 }
 0x10d   :  { %4788 = vmatpush3.msra.mxu0 %v1850_v56  ;;  %4825 = vmatprep.subr.mxu1 %v1898_v22  ;;  %v6038_v56 = vld [vmem:[%s6144_s2] sm:$0xf] }
 0x10e   :  { %4789 = vmatprep.subr.mxu0 %v1865_v11  ;;  %4826 = vmatpush3.msra.mxu1 %v1882_v23  ;;  %v6041_v11 = vsub.s32 1, %v6030_v52 }
 0x10f   :  { %4790 = vmatpush3.msra.mxu0 %v1849_v57  ;;  %4827 = vmatprep.subr.mxu1 %v1897_v24 }
 0x110   :  { %4791 = vmatprep.subr.mxu0 %v1864_v58  ;;  %4828 = vmatpush3.msra.mxu1 %v1881_v25 }
 0x111   :  { %4792 = vmatpush3.msra.mxu0 %v1848_v59  ;;  %4829 = vmatprep.subr.mxu1 %v1896_v26  ;;  %v313_v59 = vrot.slane %v6038_v56, %v6033_v55 }
 0x112   :  { %4793 = vmatprep.subr.mxu0 %v1863_v4  ;;  %4830 = vmatpush3.msra.mxu1 %v1880_v27  ;;  %v317_v4 = vrot.slane %v6038_v56, %v6041_v11 }
 0x113   :  { %4794 = vmatpush3.msra.mxu0 %v1847_v49  ;;  %4831 = vmatprep.subr.mxu1 %v1895_v28 }
 0x114   :  { %4795 = vmatprep.subr.mxu0 %v1862_v60  ;;  %4832 = vmatpush3.msra.mxu1 %v1879_v29 }
 0x115   :  { %4796 = vmatpush3.msra.mxu0 %v1846_v61  ;;  %4833 = vmatprep.subr.mxu1 %v1894_v51  ;;  %v5255_v51 = vld [vmem:[#allocation4 + $0xe0] ss:$16 sps:$4 sm:$0xff]  }
 0x116   :  { %4797 = vmatprep.subr.mxu0 %v1861_v62  ;;  %4834 = vmatpush3.msra.mxu1 %v1878_v30  ;;  %v5257_v30 = vld [vmem:[#allocation4 + $0xe4] ss:$16 sps:$4 sm:$0xff]  }
 0x117   :  { %4798 = vmatpush3.msra.mxu0 %v1845_v63  ;;  %4835 = vmatprep.subr.mxu1 %v1893_v31  ;;  %v5260_v31 = vld [vmem:[#allocation4 + $0xec] ss:$16 sps:$4 sm:$0xff]  }
 0x118   :  { %4799 = vmatprep.subr.mxu0 %v1860_v35  ;;  %4836 = vmatpush3.msra.mxu1 %v1877_v32  ;;  %v5263_v32 = vld [vmem:[#allocation4 + $0xc4] ss:$16 sps:$4 sm:$0xff]  }
 0x119   :  { %4800 = vmatpush3.msra.mxu0 %v1844_v0  ;;  %4837 = vmatprep.subr.mxu1 %v1892_v33  ;;  %v6049_v33 = vsub.s32 2, %v6030_v52 }
 0x11a   :  { %4801 = vmatprep.subr.mxu0 %v1859_v1  ;;  %4838 = vmatpush3.msra.mxu1 %v1876_v34 }
 0x11b   :  { %4802 = vmatpush3.msra.mxu0 %v1843_v2  ;;  %4839 = vmatprep.subr.mxu1 %v1891_v36 }
 0x11c   :  { %4803 = vmatprep.subr.mxu0 %v1858_v3  ;;  %4840 = vmatpush3.msra.mxu1 %v1875_v37  ;;  %v5261_v37 = vld [vmem:[#allocation4 + $0xc0] ss:$16 sps:$4 sm:$0xff]  }
 0x11d   :  { %4804 = vmatpush3.msra.mxu0 %v1842_v5  ;;  %4841 = vmatprep.subr.mxu1 %v1890_v38  ;;  %v6052_v38 = vsub.s32 3, %v6030_v52 }
 0x11e   :  { %4805 = vmatprep.subr.mxu0 %v1857_v6  ;;  %4842 = vmatpush3.msra.mxu1 %v1874_v39  ;;  %v5269_v39 = vld [vmem:[#allocation4 + $0xa4] ss:$16 sps:$4 sm:$0xff]  }
 0x11f   :  { %4806 = vmatpush3.msra.mxu0 %v1841_v7  ;;  %4843 = vmatprep.subr.mxu1 %v1889_v40  ;;  %v321_v40 = vrot.slane %v6038_v56, %v6049_v33 }
 0x120   :  { %4807 = vmatprep.subr.mxu0 %v1856_v8  ;;  %4844 = vmatpush3.msra.mxu1 %v1873_v41 }
 0x121   :  { %4808 = vmatpush3.msra.mxu0 %v1840_v9  ;;  %4845 = vmatprep.subr.mxu1 %v1888_v42 }
 0x122   :  { %4809 = vmatprep.subr.mxu0 %v1855_v10  ;;  %4846 = vmatpush3.msra.mxu1 %v1872_v43  ;;  %v5267_v43 = vld [vmem:[#allocation4 + $0xa0] ss:$16 sps:$4 sm:$0xff]  }
 0x123   :  { %4810 = vmatpush3.msra.mxu0 %v1839_v12  ;;  %4847 = vmatprep.subr.mxu1 %v1887_v44  ;;  %v325_v44 = vrot.slane %v6038_v56, %v6052_v38  ;;  %v5279_v56 = vld [vmem:[#allocation4 + $0x60] ss:$16 sps:$4 sm:$0xff]  }
 0x124   :  { %4811 = vmatprep.subr.mxu0 %v1854_v13  ;;  %4848 = vmatpush3.msra.mxu1 %v1871_v45  ;;  %v5275_v45 = vld [vmem:[#allocation4 + $0x84] ss:$16 sps:$4 sm:$0xff]  }
 0x125   :  { %4812 = vmatpush3.msra.mxu0 %v1838_v15  ;;  %4849 = vmatprep.subr.mxu1 %v1886_v46 }
 0x126   :  { %4850 = vmatpush3.msra.mxu1 %v1870_v47  ;;  %v1520_v53 = vpop.f32.mrf.mxu0  ;;  %2276 = vmatprep.subr.bf16.mxu0 %v5257_v30  ;;  %v5288_v30 = vld [vmem:[#allocation4 + $0x48] ss:$16 sps:$4 sm:$0xff]  }
 0x127   :  { %v1563_v50 = vpop.f32.mrf.mxu1  ;;  %v1521_v61 = vadd.f32 %v1520_v53, %v313_v59  ;;  %2319 = vmatprep.subr.bf16.mxu1 %v5260_v31  ;;  %v5293_v31 = vld [vmem:[#allocation4 + $0x24] ss:$16 sps:$4 sm:$0xff]  }
 0x128   :  { %v1522_v57 = vpop.f32.mrf.mxu0 }
 0x129   :  { %v1565_v54 = vpop.f32.mrf.mxu1  ;;  %v1523_v63 = vadd.f32 %v1522_v57, %v317_v4  ;;  %v1564_v0 = vadd.f32 %v1563_v50, %v1521_v61  ;;  %v5273_v50 = vld [vmem:[#allocation4 + $0x80] ss:$16 sps:$4 sm:$0xff]   ;;  %v5281_v57 = vld [vmem:[#allocation4 + $0x64] ss:$16 sps:$4 sm:$0xff]  }
 0x12a   :  { %v1524_v49 = vpop.f32.mrf.mxu0 }
 0x12b   :  { %v1567_v58 = vpop.f32.mrf.mxu1  ;;  %v1525_v1 = vadd.f32 %v1524_v49, %v313_v59  ;;  %v1566_v5 = vadd.f32 %v1565_v54, %v1523_v63 }
 0x12c   :  { %v1526_v35 = vpop.f32.mrf.mxu0 }
 0x12d   :  { %v1569_v60 = vpop.f32.mrf.mxu1  ;;  %v1527_v6 = vadd.f32 %v1526_v35, %v317_v4  ;;  %v1568_v9 = vadd.f32 %v1567_v58, %v1525_v1 }
 0x12f   :  { %v1570_v16 = vadd.f32 %v1569_v60, %v1527_v6 }
 0x147   :  { %v1649_v62 = vpop.f32.mrf.mxu1 }
 0x149   :  { %v1651_v2 = vpop.f32.mrf.mxu1 }
 0x14b   :  { %v1653_v12 = vpop.f32.mrf.mxu1 }
 0x14d   :  { %v1655_v22 = vpop.f32.mrf.mxu1 }
 0x166   :  { %v1606_v3 = vpop.f32.mrf.mxu0 }
 0x167   :  { %v1607_v7 = vadd.f32 %v1606_v3, %v1564_v0 }
 0x168   :  { %v1608_v8 = vpop.f32.mrf.mxu0 }
 0x169   :  { %v1609_v10 = vadd.f32 %v1608_v8, %v1566_v5  ;;  %v1650_v13 = vadd.f32 %v1649_v62, %v1607_v7 }
 0x16a   :  { %v1610_v15 = vpop.f32.mrf.mxu0 }
 0x16b   :  { %v1652_v17 = vadd.f32 %v1651_v2, %v1609_v10  ;;  %v1611_v18 = vadd.f32 %v1610_v15, %v1568_v9  ;;  %v1830_v23 = vmax.f32 %v1650_v13, 0.0 }
 0x16c   :  { %v1612_v19 = vpop.f32.mrf.mxu0 }
 0x16d   :  { %v1831_v20 = vmax.f32 %v1652_v17, 0.0  ;;  %v1613_v21 = vadd.f32 %v1612_v19, %v1570_v16  ;;  %v1654_v24 = vadd.f32 %v1653_v12, %v1611_v18  ;;  %v5258_v12 = vld [vmem:[#allocation4 + $0xe8] ss:$16 sps:$4 sm:$0xff]   ;;  %v5266_v17 = vld [vmem:[#allocation4 + $0xcc] ss:$16 sps:$4 sm:$0xff]  }
 0x16f   :  { %v1656_v25 = vadd.f32 %v1655_v22, %v1613_v21  ;;  %1973 = vmatprep.mubr.f32.mxu0 %v1831_v20  ;;  %v1834_v27 = vmax.f32 %v1654_v24, 0.0  ;;  %v5264_v20 = vld [vmem:[#allocation4 + $0xc8] ss:$16 sps:$4 sm:$0xff]   ;;  %v5272_v22 = vld [vmem:[#allocation4 + $0xac] ss:$16 sps:$4 sm:$0xff]  }
 0x170   :  { %1974 = vmatmul.mubr.f32.vlgmr.msra.gmra.mxu0 %v1830_v23  ;;  %v5270_v23 = vld [vmem:[#allocation4 + $0xa8] ss:$16 sps:$4 sm:$0xff]   ;;  %v5278_v24 = vld [vmem:[#allocation4 + $0x8c] ss:$16 sps:$4 sm:$0xff]  }
 0x171   :  { %v1835_v26 = vmax.f32 %v1656_v25, 0.0  ;;  %2277 = vmatpush1.bf16.msra.mxu0 %v5255_v51  ;;  %v5276_v25 = vld [vmem:[#allocation4 + $0x88] ss:$16 sps:$4 sm:$0xff]   ;;  %v5285_v51 = vld [vmem:[#allocation4 + $0x40] ss:$16 sps:$4 sm:$0xff]  }
 0x172   :  { %2278 = vmatprep.subr.bf16.mxu0 %v5263_v32  ;;  %v5291_v32 = vld [vmem:[#allocation4 + $0x20] ss:$16 sps:$4 sm:$0xff]  }
 0x173   :  { %1978 = vmatprep.mubr.f32.mxu0 %v1835_v26  ;;  %v5284_v26 = vld [vmem:[#allocation4 + $0x6c] ss:$16 sps:$4 sm:$0xff]  }
 0x174   :  { %1979 = vmatmul.mubr.f32.gmra.mxu0 %v1834_v27  ;;  %v5282_v27 = vld [vmem:[#allocation4 + $0x68] ss:$16 sps:$4 sm:$0xff]  }
 0x175   :  { %2308 = vmatprep.mubr.bf16.mxu0 %v5724_v14  ;;  %2279 = vmatpush1.bf16.msra.mxu0 %v5261_v37  ;;  %v5302_v37 = vld [vmem:[#allocation4 + $0xc] ss:$16 sps:$4 sm:$0xff]  }
 0x176   :  { %2280 = vmatprep.subr.bf16.mxu0 %v5269_v39  ;;  %v5297_v39 = vld [vmem:[#allocation4] ss:$16 sps:$4 sm:$0xff]  }
 0x179   :  { %2281 = vmatpush1.bf16.msra.mxu0 %v5267_v43 }
 0x17a   :  { %2282 = vmatprep.subr.bf16.mxu0 %v5275_v45 }
 0x17d   :  { %2283 = vmatpush1.bf16.msra.mxu0 %v5273_v50 }
 0x17e   :  { %2284 = vmatprep.subr.bf16.mxu0 %v5281_v57 }
 0x181   :  { %2285 = vmatpush1.bf16.msra.mxu0 %v5279_v56  ;;  %v5303_v56 = vld [vmem:[#allocation6 + $0x188] ss:$28 sps:$4 sm:$0xff]  }
 0x187   :  { %v1692_v28 = vpop.f32.mrf.mxu1 }
 0x188   :  { %v1693_v46 = vadd.f32 %v1692_v28, %v321_v40  ;;  %v5287_v28 = vld [vmem:[#allocation4 + $0x44] ss:$16 sps:$4 sm:$0xff]  }
 0x189   :  { %v1694_v34 = vpop.f32.mrf.mxu1  ;;  %2286 = vmatprep.subr.bf16.mxu0 %v5287_v28  ;;  %v5350_v28 = vld [vmem:[#allocation6 + $0x384] ss:$28 sps:$4 sm:$0xff]  }
 0x18a   :  { %v1695_v53 = vadd.f32 %v1694_v34, %v325_v44  ;;  %2287 = vmatpush1.bf16.msra.mxu0 %v5285_v51  ;;  %v5294_v34 = vld [vmem:[#allocation4 + $0x28] ss:$16 sps:$4 sm:$0xff]   ;;  %v5348_v51 = vld [vmem:[#allocation6 + $0x380] ss:$28 sps:$4 sm:$0xff]  }
 0x18b   :  { %v1696_v41 = vpop.f32.mrf.mxu1  ;;  %2288 = vmatprep.subr.bf16.mxu0 %v5293_v31  ;;  %v5356_v31 = vld [vmem:[#allocation6 + $0x6cc] ss:$28 sps:$4 sm:$0xff]  }
 0x18c   :  { %v1697_v4 = vadd.f32 %v1696_v41, %v321_v40  ;;  %v5300_v40 = vld [vmem:[#allocation4 + $0x8] ss:$16 sps:$4 sm:$0xff]  }
 0x18d   :  { %v1698_v47 = vpop.f32.mrf.mxu1  ;;  %v5305_v41 = vld [vmem:[#allocation6 + $0x18c] ss:$28 sps:$4 sm:$0xff]  }
 0x18e   :  { %v1699_v63 = vadd.f32 %v1698_v47, %v325_v44  ;;  %2289 = vmatpush1.bf16.msra.mxu0 %v5291_v32  ;;  %v4508_v47 = vld [vmem:[%s6146_s4] ss:$0 sm:$0xff]  ;;  %v5354_v32 = vld [vmem:[#allocation6 + $0x6c8] ss:$28 sps:$4 sm:$0xff]  }
 0x1a6   :  { %v1735_v29 = vpop.f32.mrf.mxu0 }
 0x1a7   :  { %v1736_v54 = vadd.f32 %v1735_v29, %v1693_v46  ;;  %v5290_v29 = vld [vmem:[#allocation4 + $0x4c] ss:$16 sps:$4 sm:$0xff]  }
 0x1a8   :  { %v1737_v36 = vpop.f32.mrf.mxu0 }
 0x1a9   :  { %v1738_v49 = vadd.f32 %v1737_v36, %v1695_v53  ;;  %v5299_v36 = vld [vmem:[#allocation4 + $0x4] ss:$16 sps:$4 sm:$0xff]  }
 0x1aa   :  { %v1739_v42 = vpop.f32.mrf.mxu0  ;;  %2290 = vmatprep.subr.bf16.mxu0 %v5299_v36  ;;  %v5362_v36 = vld [vmem:[#allocation6 + $0x694] ss:$28 sps:$4 sm:$0xff]  }
 0x1ab   :  { %v1740_v35 = vadd.f32 %v1739_v42, %v1697_v4  ;;  %2291 = vmatpush1.bf16.msra.mxu0 %v5297_v39  ;;  %v5308_v42 = vld [vmem:[#allocation6 + $0x50c] ss:$28 sps:$4 sm:$0xff]  }
 0x1ac   :  { %v1741_v48 = vpop.f32.mrf.mxu0  ;;  %3819 = vmatprep.subr.bf16.mxu0 %v5305_v41  ;;  %v5360_v39 = vld [vmem:[#allocation6 + $0x690] ss:$28 sps:$4 sm:$0xff]   ;;  %v5368_v41 = vld [vmem:[#allocation6 + $0x65c] ss:$28 sps:$4 sm:$0xff]  }
 0x1ad   :  { %v1742_v5 = vadd.f32 %v1741_v48, %v1699_v63  ;;  %v5306_v63 = vld [vmem:[#allocation6 + $0x508] ss:$28 sps:$4 sm:$0xff]  }
 0x1c6   :  { %v1821_v59 = vpop.f32.mrf.mxu0 }
 0x1c7   :  { %v1778_v58 = vpop.f32.mrf.mxu1 }
 0x1c8   :  { %v1779_v60 = vadd.f32 %v1778_v58, %v1736_v54  ;;  %v1823_v62 = vpop.f32.mrf.mxu0 }
 0x1c9   :  { %v1780_v61 = vpop.f32.mrf.mxu1 }
 0x1ca   :  { %v1781_v0 = vadd.f32 %v1780_v61, %v1738_v49  ;;  %v1822_v1 = vadd.f32 %v1821_v59, %v1779_v60  ;;  %v1825_v3 = vpop.f32.mrf.mxu0 }
 0x1cb   :  { %v1782_v2 = vpop.f32.mrf.mxu1 }
 0x1cc   :  { %v1824_v6 = vadd.f32 %v1823_v62, %v1781_v0  ;;  %v1783_v7 = vadd.f32 %v1782_v2, %v1740_v35  ;;  %v1832_v13 = vmax.f32 %v1822_v1, 0.0  ;;  %v1827_v16 = vpop.f32.mrf.mxu0  ;;  %v5311_v0 = vld [vmem:[#allocation6 + $0x154] ss:$28 sps:$4 sm:$0xff]  }
 0x1cd   :  { %v1784_v8 = vpop.f32.mrf.mxu1  ;;  %v5314_v1 = vld [vmem:[#allocation6 + $0x4d4] ss:$28 sps:$4 sm:$0xff]  }
 0x1ce   :  { %v1833_v9 = vmax.f32 %v1824_v6, 0.0  ;;  %v1785_v10 = vadd.f32 %v1784_v8, %v1742_v5  ;;  %v1826_v15 = vadd.f32 %v1825_v3, %v1783_v7  ;;  %v5309_v2 = vld [vmem:[#allocation6 + $0x150] ss:$28 sps:$4 sm:$0xff]   ;;  %v5317_v5 = vld [vmem:[#allocation6 + $0x11c] ss:$28 sps:$4 sm:$0xff]  }
 0x1cf   :  { %v5312_v3 = vld [vmem:[#allocation6 + $0x4d0] ss:$28 sps:$4 sm:$0xff]   ;;  %v5320_v6 = vld [vmem:[#allocation6 + $0x49c] ss:$28 sps:$4 sm:$0xff]  }
 0x1d0   :  { %v1828_v18 = vadd.f32 %v1827_v16, %v1785_v10  ;;  %2048 = vmatprep.mubr.f32.mxu1 %v1833_v9  ;;  %v1836_v21 = vmax.f32 %v1826_v15, 0.0  ;;  %v5315_v7 = vld [vmem:[#allocation6 + $0x118] ss:$28 sps:$4 sm:$0xff]   ;;  %v5323_v9 = vld [vmem:[#allocation6 + $0xe4] ss:$28 sps:$4 sm:$0xff]  }
 0x1d1   :  { %2049 = vmatmul.mubr.f32.vlgmr.msra.gmra.mxu1 %v1832_v13  ;;  %v5318_v8 = vld [vmem:[#allocation6 + $0x498] ss:$28 sps:$4 sm:$0xff]   ;;  %v5326_v10 = vld [vmem:[#allocation6 + $0x464] ss:$28 sps:$4 sm:$0xff]   ;;  %v5329_v15 = vld [vmem:[#allocation6 + $0xac] ss:$28 sps:$4 sm:$0xff]  }
 0x1d2   :  { %v1837_v19 = vmax.f32 %v1828_v18, 0.0  ;;  %2320 = vmatpush1.bf16.msra.mxu1 %v5258_v12  ;;  %v5321_v12 = vld [vmem:[#allocation6 + $0xe0] ss:$28 sps:$4 sm:$0xff]   ;;  %v5332_v16 = vld [vmem:[#allocation6 + $0x42c] ss:$28 sps:$4 sm:$0xff]  }
 0x1d3   :  { %2321 = vmatprep.subr.bf16.mxu1 %v5266_v17  ;;  %v5324_v13 = vld [vmem:[#allocation6 + $0x460] ss:$28 sps:$4 sm:$0xff]   ;;  %v5327_v17 = vld [vmem:[#allocation6 + $0xa8] ss:$28 sps:$4 sm:$0xff]  }
 0x1d4   :  { %2053 = vmatprep.mubr.f32.mxu1 %v1837_v19  ;;  %v5330_v18 = vld [vmem:[#allocation6 + $0x428] ss:$28 sps:$4 sm:$0xff]   ;;  %v5335_v19 = vld [vmem:[#allocation6 + $0x74] ss:$28 sps:$4 sm:$0xff]  }
 0x1d5   :  { %2054 = vmatmul.mubr.f32.gmra.mxu1 %v1836_v21  ;;  %v5333_v21 = vld [vmem:[#allocation6 + $0x70] ss:$28 sps:$4 sm:$0xff]  }
 0x1d6   :  { %2322 = vmatpush1.bf16.msra.mxu1 %v5264_v20  ;;  %2351 = vmatprep.mubr.bf16.mxu1 %v5724_v14  ;;  %v5296_v14 = vld [vmem:[#allocation4 + $0x2c] ss:$16 sps:$4 sm:$0xff]   ;;  %v5338_v20 = vld [vmem:[#allocation6 + $0x3f4] ss:$28 sps:$4 sm:$0xff]  }
 0x1d7   :  { %2323 = vmatprep.subr.bf16.mxu1 %v5272_v22  ;;  %v5336_v22 = vld [vmem:[#allocation6 + $0x3f0] ss:$28 sps:$4 sm:$0xff]  }
 0x1da   :  { %2324 = vmatpush1.bf16.msra.mxu1 %v5270_v23  ;;  %v5341_v23 = vld [vmem:[#allocation6 + $0x3c] ss:$28 sps:$4 sm:$0xff]  }
 0x1db   :  { %2325 = vmatprep.subr.bf16.mxu1 %v5278_v24  ;;  %v5344_v24 = vld [vmem:[#allocation6 + $0x3bc] ss:$28 sps:$4 sm:$0xff]  }
 0x1de   :  { %2326 = vmatpush1.bf16.msra.mxu1 %v5276_v25  ;;  %v5339_v25 = vld [vmem:[#allocation6 + $0x38] ss:$28 sps:$4 sm:$0xff]  }
 0x1df   :  { %2327 = vmatprep.subr.bf16.mxu1 %v5284_v26  ;;  %v5342_v26 = vld [vmem:[#allocation6 + $0x3b8] ss:$28 sps:$4 sm:$0xff]  }
 0x1e2   :  { %2328 = vmatpush1.bf16.msra.mxu1 %v5282_v27  ;;  %v5347_v27 = vld [vmem:[#allocation6 + $0x4] ss:$28 sps:$4 sm:$0xff]  }
 0x1e3   :  { %2329 = vmatprep.subr.bf16.mxu1 %v5290_v29  ;;  %v5345_v29 = vld [vmem:[#allocation6] ss:$28 sps:$4 sm:$0xff]  }
 0x1e6   :  { %2330 = vmatpush1.bf16.msra.mxu1 %v5288_v30  ;;  %v5353_v30 = vld [vmem:[#allocation6 + $0x34c] ss:$28 sps:$4 sm:$0xff]  }
 0x1e7   :  { %2331 = vmatprep.subr.bf16.mxu1 %v5296_v14  ;;  %v5351_v14 = vld [vmem:[#allocation6 + $0x348] ss:$28 sps:$4 sm:$0xff]  }
 0x1ea   :  { %2332 = vmatpush1.bf16.msra.mxu1 %v5294_v34  ;;  %v5359_v34 = vld [vmem:[#allocation6 + $0x314] ss:$28 sps:$4 sm:$0xff]  }
 0x1eb   :  { %2333 = vmatprep.subr.bf16.mxu1 %v5302_v37  ;;  %v5357_v37 = vld [vmem:[#allocation6 + $0x310] ss:$28 sps:$4 sm:$0xff]  }
 0x1ee   :  { %2334 = vmatpush1.bf16.msra.mxu1 %v5300_v40  ;;  %v5365_v40 = vld [vmem:[#allocation6 + $0x2dc] ss:$28 sps:$4 sm:$0xff]  }
 0x1ef   :  { %3862 = vmatprep.subr.bf16.mxu1 %v5308_v42  ;;  %v5363_v42 = vld [vmem:[#allocation6 + $0x2d8] ss:$28 sps:$4 sm:$0xff]  }
 0x230   :  { %v4813_v43 = vpop.f32.mrf.mxu0 }
 0x232   :  { %v4814_v44 = vpop.f32.mrf.mxu0 }
 0x233   :  { %v4815_v46 = vadd.f32 %v4814_v44, %v4813_v43  ;;  %v5366_v43 = vld [vmem:[#allocation6 + $0x658] ss:$28 sps:$4 sm:$0xff]   ;;  %v5371_v44 = vld [vmem:[#allocation6 + $0x2a4] ss:$28 sps:$4 sm:$0xff]  }
 0x234   :  { %v4816_v45 = vpop.f32.mrf.mxu0 }
 0x235   :  { %v1976_v54 = vadd.f32 %v4815_v46, %v4508_v47  ;;  %v5369_v46 = vld [vmem:[#allocation6 + $0x2a0] ss:$28 sps:$4 sm:$0xff]  }
 0x236   :  { %v4817_v48 = vpop.f32.mrf.mxu0 }
 0x237   :  { %v4818_v57 = vadd.f32 %v4817_v48, %v4816_v45  ;;  %v5374_v45 = vld [vmem:[#allocation6 + $0x624] ss:$28 sps:$4 sm:$0xff]   ;;  %v5377_v48 = vld [vmem:[#allocation6 + $0x26c] ss:$28 sps:$4 sm:$0xff]  }
 0x239   :  { %v1981_v60 = vadd.f32 %v4818_v57, %v4508_v47  ;;  %v5372_v47 = vld [vmem:[#allocation6 + $0x620] ss:$28 sps:$4 sm:$0xff]   ;;  %v5383_v57 = vld [vmem:[#allocation6 + $0x234] ss:$28 sps:$4 sm:$0xff]  }
 0x291   :  { %v4851_v50 = vpop.f32.mrf.mxu1 }
 0x293   :  { %v4852_v53 = vpop.f32.mrf.mxu1 }
 0x294   :  { %v4853_v58 = vadd.f32 %v4852_v53, %v4851_v50  ;;  %v5380_v50 = vld [vmem:[#allocation6 + $0x5ec] ss:$28 sps:$4 sm:$0xff]  }
 0x295   :  { %v4854_v59 = vpop.f32.mrf.mxu1  ;;  %v5375_v53 = vld [vmem:[#allocation6 + $0x268] ss:$28 sps:$4 sm:$0xff]  }
 0x296   :  { %v2051_v4 = vadd.f32 %v4853_v58, %v1976_v54  ;;  %v5378_v54 = vld [vmem:[#allocation6 + $0x5e8] ss:$28 sps:$4 sm:$0xff]   ;;  %v5386_v58 = vld [vmem:[#allocation6 + $0x5b4] ss:$28 sps:$4 sm:$0xff]  }
 0x297   :  { %v4855_v49 = vpop.f32.mrf.mxu1 }
 0x298   :  { %2059 = vst [vmem:[%s6152_s10] sm:$0xff] %v2051_v4  ;;  %v4856_v61 = vadd.f32 %v4855_v49, %v4854_v59  ;;  %v5381_v59 = vld [vmem:[#allocation6 + $0x230] ss:$28 sps:$4 sm:$0xff]   ;;  %v5389_v49 = vld [vmem:[#allocation6 + $0x1fc] ss:$28 sps:$4 sm:$0xff]  }
 0x29a   :  { %v2056_v62 = vadd.f32 %v4856_v61, %v1981_v60  ;;  %v5392_v60 = vld [vmem:[#allocation6 + $0x57c] ss:$28 sps:$4 sm:$0xff]  }
 0x29b   :  { %v5387_v61 = vld [vmem:[#allocation6 + $0x1f8] ss:$28 sps:$4 sm:$0xff]  }
 0x29c   :  { %2060 = vst [vmem:[%s6152_s10 + $0x8] sm:$0xff] %v2056_v62  ;;  %v2061_v35 = vpack.c.bf16 %v2056_v62, %v2051_v4  ;;  %v5384_v4 = vld [vmem:[#allocation6 + $0x5b0] ss:$28 sps:$4 sm:$0xff]   ;;  %v5390_v62 = vld [vmem:[#allocation6 + $0x578] ss:$28 sps:$4 sm:$0xff]  }
 0x29e   :  { %2309 = vmatmul.mubr.bf16.vlgmr.msra.gmra.mxu0 %v2061_v35  ;;  %2352 = vmatmul.mubr.bf16.vlgmr.msra.gmra.mxu1 %v2061_v35  ;;  %v5393_v35 = vld [vmem:[#allocation6 + $0x1c0] ss:$28 sps:$4 sm:$0xff]  }
 0x29f   :  { %3820 = vmatpush1.bf16.msra.mxu0 %v5303_v56  ;;  %3863 = vmatpush1.bf16.msra.mxu1 %v5306_v63  ;;  %v5395_v56 = vld [vmem:[#allocation6 + $0x1c4] ss:$28 sps:$4 sm:$0xff]  }
 0x2a0   :  { %3821 = vmatprep.subr.bf16.mxu0 %v5311_v0  ;;  %3864 = vmatprep.subr.bf16.mxu1 %v5314_v1  ;;  %v5398_v63 = vld [vmem:[#allocation6 + $0x544] ss:$28 sps:$4 sm:$0xff]   ;;  %v5401_v1 = vld [vmem:[#allocation6 + $0x194] ss:$28 sps:$4 sm:$0xff]  }
 0x2a1   :  { %v5396_v0 = vld [vmem:[#allocation6 + $0x540] ss:$28 sps:$4 sm:$0xff]  }
 0x2a3   :  { %3822 = vmatpush1.bf16.msra.mxu0 %v5309_v2  ;;  %3865 = vmatpush1.bf16.msra.mxu1 %v5312_v3  ;;  %v5404_v2 = vld [vmem:[#allocation6 + $0x514] ss:$28 sps:$4 sm:$0xff]   ;;  %v2094_v3 = vld [vmem:[%s6148_s6] sm:$0xf] }
 0x2a4   :  { %3823 = vmatprep.subr.bf16.mxu0 %v5317_v5  ;;  %3866 = vmatprep.subr.bf16.mxu1 %v5320_v6 }
 0x2a7   :  { %3824 = vmatpush1.bf16.msra.mxu0 %v5315_v7  ;;  %3867 = vmatpush1.bf16.msra.mxu1 %v5318_v8  ;;  %v2103_v7 = vrot.slane %v2094_v3, %v6041_v11  ;;  %v2111_v8 = vrot.slane %v2094_v3, %v6052_v38 }
 0x2a8   :  { %3825 = vmatprep.subr.bf16.mxu0 %v5323_v9  ;;  %3868 = vmatprep.subr.bf16.mxu1 %v5326_v10  ;;  %v2099_v9 = vrot.slane %v2094_v3, %v6033_v55  ;;  %v2107_v10 = vrot.slane %v2094_v3, %v6049_v33  ;;  %v5443_v3 = vld [vmem:[#allocation6 + $0xc] ss:$28 sps:$4 sm:$0xff]  }
 0x2ab   :  { %3826 = vmatpush1.bf16.msra.mxu0 %v5321_v12  ;;  %3869 = vmatpush1.bf16.msra.mxu1 %v5324_v13 }
 0x2ac   :  { %3827 = vmatprep.subr.bf16.mxu0 %v5329_v15  ;;  %3870 = vmatprep.subr.bf16.mxu1 %v5332_v16 }
 0x2af   :  { %3828 = vmatpush1.bf16.msra.mxu0 %v5327_v17  ;;  %3871 = vmatpush1.bf16.msra.mxu1 %v5330_v18 }
 0x2b0   :  { %3829 = vmatprep.subr.bf16.mxu0 %v5335_v19  ;;  %3872 = vmatprep.subr.bf16.mxu1 %v5338_v20 }
 0x2b3   :  { %3830 = vmatpush1.bf16.msra.mxu0 %v5333_v21  ;;  %3873 = vmatpush1.bf16.msra.mxu1 %v5336_v22 }
 0x2b4   :  { %3831 = vmatprep.subr.bf16.mxu0 %v5341_v23  ;;  %3874 = vmatprep.subr.bf16.mxu1 %v5344_v24 }
 0x2b7   :  { %3832 = vmatpush1.bf16.msra.mxu0 %v5339_v25  ;;  %3875 = vmatpush1.bf16.msra.mxu1 %v5342_v26 }
 0x2b8   :  { %3833 = vmatprep.subr.bf16.mxu0 %v5347_v27  ;;  %3876 = vmatprep.subr.bf16.mxu1 %v5350_v28 }
 0x2bb   :  { %3834 = vmatpush1.bf16.msra.mxu0 %v5345_v29  ;;  %3877 = vmatpush1.bf16.msra.mxu1 %v5348_v51 }
 0x2bc   :  { %3835 = vmatprep.subr.bf16.mxu0 %v5353_v30  ;;  %3878 = vmatprep.subr.bf16.mxu1 %v5356_v31 }
 0x2bf   :  { %3836 = vmatpush2.bf16.msra.mxu0 %v5351_v14  ;;  %3879 = vmatpush2.bf16.msra.mxu1 %v5354_v32 }
 0x2c0   :  { %3837 = vmatprep.subr.bf16.mxu0 %v5359_v34  ;;  %3880 = vmatprep.subr.bf16.mxu1 %v5362_v36 }
 0x2c3   :  { %3838 = vmatpush2.bf16.msra.mxu0 %v5357_v37  ;;  %3881 = vmatpush2.bf16.msra.mxu1 %v5360_v39  ;;  %v5399_v37 = vld [vmem:[#allocation6 + $0x190] ss:$28 sps:$4 sm:$0xff]  }
 0x2c4   :  { %3839 = vmatprep.subr.bf16.mxu0 %v5365_v40  ;;  %3882 = vmatprep.subr.bf16.mxu1 %v5368_v41  ;;  %v5402_v39 = vld [vmem:[#allocation6 + $0x510] ss:$28 sps:$4 sm:$0xff]  }
 0x2c7   :  { %3840 = vmatpush2.bf16.msra.mxu0 %v5363_v42  ;;  %3883 = vmatpush2.bf16.msra.mxu1 %v5366_v43  ;;  %v5407_v42 = vld [vmem:[#allocation6 + $0x15c] ss:$28 sps:$4 sm:$0xff]  }
 0x2c8   :  { %3841 = vmatprep.subr.bf16.mxu0 %v5371_v44  ;;  %3884 = vmatprep.subr.bf16.mxu1 %v5374_v45  ;;  %v5410_v43 = vld [vmem:[#allocation6 + $0x4dc] ss:$28 sps:$4 sm:$0xff]  }
 0x2c9   :  { %v5405_v44 = vld [vmem:[#allocation6 + $0x158] ss:$28 sps:$4 sm:$0xff]  }
 0x2ca   :  { %v5408_v45 = vld [vmem:[#allocation6 + $0x4d8] ss:$28 sps:$4 sm:$0xff]  }
 0x2cb   :  { %3842 = vmatpush2.bf16.msra.mxu0 %v5369_v46  ;;  %3885 = vmatpush2.bf16.msra.mxu1 %v5372_v47  ;;  %v5413_v46 = vld [vmem:[#allocation6 + $0x124] ss:$28 sps:$4 sm:$0xff]  }
 0x2cc   :  { %3843 = vmatprep.subr.bf16.mxu0 %v5377_v48  ;;  %3886 = vmatprep.subr.bf16.mxu1 %v5380_v50  ;;  %v5416_v47 = vld [vmem:[#allocation6 + $0x4a4] ss:$28 sps:$4 sm:$0xff]  }
 0x2cd   :  { %v5411_v48 = vld [vmem:[#allocation6 + $0x120] ss:$28 sps:$4 sm:$0xff]  }
 0x2ce   :  { %v5414_v50 = vld [vmem:[#allocation6 + $0x4a0] ss:$28 sps:$4 sm:$0xff]  }
 0x2cf   :  { %3844 = vmatpush2.bf16.msra.mxu0 %v5375_v53  ;;  %3887 = vmatpush2.bf16.msra.mxu1 %v5378_v54  ;;  %v5419_v53 = vld [vmem:[#allocation6 + $0xec] ss:$28 sps:$4 sm:$0xff]  }
 0x2d0   :  { %3845 = vmatprep.subr.bf16.mxu0 %v5383_v57  ;;  %3888 = vmatprep.subr.bf16.mxu1 %v5386_v58  ;;  %v5422_v54 = vld [vmem:[#allocation6 + $0x46c] ss:$28 sps:$4 sm:$0xff]  }
 0x2d1   :  { %v5417_v57 = vld [vmem:[#allocation6 + $0xe8] ss:$28 sps:$4 sm:$0xff]  }
 0x2d2   :  { %v5420_v58 = vld [vmem:[#allocation6 + $0x468] ss:$28 sps:$4 sm:$0xff]  }
 0x2d3   :  { %3846 = vmatpush2.bf16.msra.mxu0 %v5381_v59  ;;  %3889 = vmatpush2.bf16.msra.mxu1 %v5384_v4  ;;  %v5425_v59 = vld [vmem:[#allocation6 + $0xb4] ss:$28 sps:$4 sm:$0xff]  }
 0x2d4   :  { %3847 = vmatprep.subr.bf16.mxu0 %v5389_v49  ;;  %3890 = vmatprep.subr.bf16.mxu1 %v5392_v60  ;;  %v5428_v4 = vld [vmem:[#allocation6 + $0x434] ss:$28 sps:$4 sm:$0xff]  }
 0x2d5   :  { %v5423_v49 = vld [vmem:[#allocation6 + $0xb0] ss:$28 sps:$4 sm:$0xff]  }
 0x2d6   :  { %v5426_v60 = vld [vmem:[#allocation6 + $0x430] ss:$28 sps:$4 sm:$0xff]  }
 0x2d7   :  { %3848 = vmatpush2.bf16.msra.mxu0 %v5387_v61  ;;  %3891 = vmatpush2.bf16.msra.mxu1 %v5390_v62  ;;  %v5431_v61 = vld [vmem:[#allocation6 + $0x7c] ss:$28 sps:$4 sm:$0xff]  }
 0x2d8   :  { %3849 = vmatprep.subr.bf16.mxu0 %v5395_v56  ;;  %3892 = vmatprep.subr.bf16.mxu1 %v5398_v63  ;;  %v5434_v62 = vld [vmem:[#allocation6 + $0x3fc] ss:$28 sps:$4 sm:$0xff]  }
 0x2d9   :  { %v5429_v56 = vld [vmem:[#allocation6 + $0x78] ss:$28 sps:$4 sm:$0xff]  }
 0x2da   :  { %v5432_v63 = vld [vmem:[#allocation6 + $0x3f8] ss:$28 sps:$4 sm:$0xff]  }
 0x2db   :  { %3850 = vmatpush2.bf16.msra.mxu0 %v5393_v35  ;;  %3893 = vmatpush2.bf16.msra.mxu1 %v5396_v0  ;;  %v5437_v35 = vld [vmem:[#allocation6 + $0x44] ss:$28 sps:$4 sm:$0xff]  }
 0x2dc   :  { %3905 = vmatprep.subr.bf16.mxu0 %v5401_v1  ;;  %3948 = vmatprep.subr.bf16.mxu1 %v5404_v2  ;;  %v5440_v0 = vld [vmem:[#allocation6 + $0x3c4] ss:$28 sps:$4 sm:$0xff]  }
 0x2dd   :  { %v5435_v1 = vld [vmem:[#allocation6 + $0x40] ss:$28 sps:$4 sm:$0xff]  }
 0x2de   :  { %v5438_v2 = vld [vmem:[#allocation6 + $0x3c0] ss:$28 sps:$4 sm:$0xff]  }
 0x35e   :  { %v2310_v5 = vpop.f32.mrf.mxu0  ;;  %v2353_v6 = vpop.f32.mrf.mxu1 }
 0x35f   :  { %v2311_v21 = vadd.f32 %v2310_v5, %v2099_v9  ;;  %v2354_v22 = vadd.f32 %v2353_v6, %v2107_v10  ;;  %v5446_v5 = vld [vmem:[#allocation6 + $0x38c] ss:$28 sps:$4 sm:$0xff]  }
 0x360   :  { %v2312_v12 = vpop.f32.mrf.mxu0  ;;  %v2355_v13 = vpop.f32.mrf.mxu1  ;;  %v5441_v6 = vld [vmem:[#allocation6 + $0x8] ss:$28 sps:$4 sm:$0xff]  }
 0x361   :  { %v2313_v17 = vadd.f32 %v2312_v12, %v2103_v7  ;;  %v2356_v18 = vadd.f32 %v2355_v13, %v2111_v8  ;;  %v2362_v14 = vmax.f32 %v2311_v21, 0.0  ;;  %v2364_v32 = vmax.f32 %v2354_v22, 0.0  ;;  %v5450_v12 = vld [vmem:[#allocation6 + $0x6d0] ss:$28 sps:$4 sm:$0xff]   ;;  %v5455_v13 = vld [vmem:[#allocation6 + $0x31c] ss:$28 sps:$4 sm:$0xff]  }
 0x362   :  { %v2314_v15 = vpop.f32.mrf.mxu0  ;;  %v2357_v16 = vpop.f32.mrf.mxu1  ;;  %v5462_v21 = vld [vmem:[#allocation6 + $0x660] ss:$28 sps:$4 sm:$0xff]   ;;  %v5467_v22 = vld [vmem:[#allocation6 + $0x2ac] ss:$28 sps:$4 sm:$0xff]  }
 0x363   :  { %v2315_v19 = vadd.f32 %v2314_v15, %v2099_v9  ;;  %v2358_v20 = vadd.f32 %v2357_v16, %v2107_v10  ;;  %v2363_v29 = vmax.f32 %v2313_v17, 0.0  ;;  %v2365_v51 = vmax.f32 %v2356_v18, 0.0  ;;  %v5452_v9 = vld [vmem:[#allocation6 + $0x6d4] ss:$28 sps:$4 sm:$0xff]   ;;  %v5458_v15 = vld [vmem:[#allocation6 + $0x69c] ss:$28 sps:$4 sm:$0xff]  }
 0x364   :  { %v2316_v23 = vpop.f32.mrf.mxu0  ;;  %v2359_v24 = vpop.f32.mrf.mxu1  ;;  %v5447_v10 = vld [vmem:[#allocation6 + $0x350] ss:$28 sps:$4 sm:$0xff]   ;;  %v5453_v16 = vld [vmem:[#allocation6 + $0x318] ss:$28 sps:$4 sm:$0xff]   ;;  %v5461_v18 = vld [vmem:[#allocation6 + $0x2e4] ss:$28 sps:$4 sm:$0xff]  }
 0x365   :  { %v2317_v25 = vadd.f32 %v2316_v23, %v2103_v7  ;;  %v2360_v26 = vadd.f32 %v2359_v24, %v2111_v8  ;;  %v2366_v27 = vmax.f32 %v2315_v19, 0.0  ;;  %v2368_v28 = vmax.f32 %v2358_v20, 0.0  ;;  %v5444_v7 = vld [vmem:[#allocation6 + $0x388] ss:$28 sps:$4 sm:$0xff]   ;;  %v5449_v8 = vld [vmem:[#allocation6 + $0x354] ss:$28 sps:$4 sm:$0xff]  }
 0x366   :  { %v5456_v17 = vld [vmem:[#allocation6 + $0x698] ss:$28 sps:$4 sm:$0xff]   ;;  %v5464_v19 = vld [vmem:[#allocation6 + $0x664] ss:$28 sps:$4 sm:$0xff]   ;;  %v5470_v23 = vld [vmem:[#allocation6 + $0x62c] ss:$28 sps:$4 sm:$0xff]  }
 0x367   :  { %v2367_v30 = vmax.f32 %v2317_v25, 0.0  ;;  %v2369_v31 = vmax.f32 %v2360_v26, 0.0  ;;  %v6079_v40 = vpack.c.bf16 %v2366_v27, %v2362_v14  ;;  %v6081_v41 = vpack.c.bf16 %v2368_v28, %v2364_v32  ;;  %v5459_v20 = vld [vmem:[#allocation6 + $0x2e0] ss:$28 sps:$4 sm:$0xff]   ;;  %v5465_v24 = vld [vmem:[#allocation6 + $0x2a8] ss:$28 sps:$4 sm:$0xff]  }
 0x368   :  { %v5468_v25 = vld [vmem:[#allocation6 + $0x628] ss:$28 sps:$4 sm:$0xff]   ;;  %v5473_v26 = vld [vmem:[#allocation6 + $0x274] ss:$28 sps:$4 sm:$0xff]  }
 0x369   :  { %v6075_v34 = vpack.c.bf16 %v2367_v30, %v2363_v29  ;;  %v6077_v36 = vpack.c.bf16 %v2369_v31, %v2365_v51  ;;  %v5476_v27 = vld [vmem:[#allocation6 + $0x5f4] ss:$28 sps:$4 sm:$0xff]   ;;  %v5479_v51 = vld [vmem:[#allocation6 + $0x23c] ss:$28 sps:$4 sm:$0xff]   ;;  %v5485_v32 = vld [vmem:[#allocation6 + $0x204] ss:$28 sps:$4 sm:$0xff]  }
 0x36a   :  { %v5471_v28 = vld [vmem:[#allocation6 + $0x270] ss:$28 sps:$4 sm:$0xff]   ;;  %v5482_v30 = vld [vmem:[#allocation6 + $0x5bc] ss:$28 sps:$4 sm:$0xff]  }
 0x36b   :  { %3851 = vmatprep.mubr.bf16.mxu0 %v6075_v34  ;;  %3894 = vmatprep.mubr.bf16.mxu1 %v6077_v36  ;;  %v5474_v29 = vld [vmem:[#allocation6 + $0x5f0] ss:$28 sps:$4 sm:$0xff]   ;;  %v5477_v31 = vld [vmem:[#allocation6 + $0x238] ss:$28 sps:$4 sm:$0xff]  }
 0x36c   :  { %3852 = vmatmul.mubr.bf16.vlgmr.msra.gmra.mxu0 %v6079_v40  ;;  %3895 = vmatmul.mubr.bf16.vlgmr.msra.gmra.mxu1 %v6081_v41  ;;  %v5480_v14 = vld [vmem:[#allocation6 + $0x5b8] ss:$28 sps:$4 sm:$0xff]  }
 0x36d   :  { %3906 = vmatpush1.bf16.msra.mxu0 %v5399_v37  ;;  %3949 = vmatpush1.bf16.msra.mxu1 %v5402_v39  ;;  %v5488_v37 = vld [vmem:[#allocation6 + $0x584] ss:$28 sps:$4 sm:$0xff]  }
 0x36e   :  { %3937 = vmatprep.mubr.bf16.mxu0 %v6075_v34  ;;  %3980 = vmatprep.mubr.bf16.mxu1 %v6077_v36  ;;  %v5483_v39 = vld [vmem:[#allocation6 + $0x200] ss:$28 sps:$4 sm:$0xff]  }
 0x36f   :  { %3907 = vmatprep.subr.bf16.mxu0 %v5407_v42  ;;  %3950 = vmatprep.subr.bf16.mxu1 %v5410_v43  ;;  %v5486_v42 = vld [vmem:[#allocation6 + $0x580] ss:$28 sps:$4 sm:$0xff]   ;;  %v5491_v43 = vld [vmem:[#allocation6 + $0x1cc] ss:$28 sps:$4 sm:$0xff]  }
 0x371   :  { %3908 = vmatpush1.bf16.msra.mxu0 %v5405_v44  ;;  %3951 = vmatpush1.bf16.msra.mxu1 %v5408_v45  ;;  %v5494_v44 = vld [vmem:[#allocation6 + $0x54c] ss:$28 sps:$4 sm:$0xff]  }
 0x372   :  { %3909 = vmatprep.subr.bf16.mxu0 %v5413_v46  ;;  %3952 = vmatprep.subr.bf16.mxu1 %v5416_v47  ;;  %v5489_v45 = vld [vmem:[#allocation6 + $0x1c8] ss:$28 sps:$4 sm:$0xff]   ;;  %v5497_v47 = vld [vmem:[#allocation6 + $0x19c] ss:$28 sps:$4 sm:$0xff]  }
 0x373   :  { %v5492_v46 = vld [vmem:[#allocation6 + $0x548] ss:$28 sps:$4 sm:$0xff]  }
 0x375   :  { %3910 = vmatpush1.bf16.msra.mxu0 %v5411_v48  ;;  %3953 = vmatpush1.bf16.msra.mxu1 %v5414_v50  ;;  %v5500_v48 = vld [vmem:[#allocation6 + $0x51c] ss:$28 sps:$4 sm:$0xff]  }
 0x376   :  { %3911 = vmatprep.subr.bf16.mxu0 %v5419_v53  ;;  %3954 = vmatprep.subr.bf16.mxu1 %v5422_v54  ;;  %v5495_v50 = vld [vmem:[#allocation6 + $0x198] ss:$28 sps:$4 sm:$0xff]   ;;  %v5503_v54 = vld [vmem:[#allocation6 + $0x164] ss:$28 sps:$4 sm:$0xff]  }
 0x377   :  { %v5498_v53 = vld [vmem:[#allocation6 + $0x518] ss:$28 sps:$4 sm:$0xff]  }
 0x379   :  { %3912 = vmatpush1.bf16.msra.mxu0 %v5417_v57  ;;  %3955 = vmatpush1.bf16.msra.mxu1 %v5420_v58  ;;  %v5506_v57 = vld [vmem:[#allocation6 + $0x4e4] ss:$28 sps:$4 sm:$0xff]  }
 0x37a   :  { %3913 = vmatprep.subr.bf16.mxu0 %v5425_v59  ;;  %3956 = vmatprep.subr.bf16.mxu1 %v5428_v4  ;;  %v5501_v58 = vld [vmem:[#allocation6 + $0x160] ss:$28 sps:$4 sm:$0xff]   ;;  %v5509_v4 = vld [vmem:[#allocation6 + $0x12c] ss:$28 sps:$4 sm:$0xff]  }
 0x37b   :  { %v5504_v59 = vld [vmem:[#allocation6 + $0x4e0] ss:$28 sps:$4 sm:$0xff]  }
 0x37d   :  { %3914 = vmatpush1.bf16.msra.mxu0 %v5423_v49  ;;  %3957 = vmatpush1.bf16.msra.mxu1 %v5426_v60  ;;  %v5512_v49 = vld [vmem:[#allocation6 + $0x4ac] ss:$28 sps:$4 sm:$0xff]  }
 0x37e   :  { %3915 = vmatprep.subr.bf16.mxu0 %v5431_v61  ;;  %3958 = vmatprep.subr.bf16.mxu1 %v5434_v62  ;;  %v5507_v60 = vld [vmem:[#allocation6 + $0x128] ss:$28 sps:$4 sm:$0xff]   ;;  %v5515_v62 = vld [vmem:[#allocation6 + $0xf4] ss:$28 sps:$4 sm:$0xff]  }
 0x37f   :  { %v5510_v61 = vld [vmem:[#allocation6 + $0x4a8] ss:$28 sps:$4 sm:$0xff]  }
 0x381   :  { %3916 = vmatpush1.bf16.msra.mxu0 %v5429_v56  ;;  %3959 = vmatpush1.bf16.msra.mxu1 %v5432_v63  ;;  %v5518_v56 = vld [vmem:[#allocation6 + $0x474] ss:$28 sps:$4 sm:$0xff]  }
 0x382   :  { %3917 = vmatprep.subr.bf16.mxu0 %v5437_v35  ;;  %3960 = vmatprep.subr.bf16.mxu1 %v5440_v0  ;;  %v5513_v63 = vld [vmem:[#allocation6 + $0xf0] ss:$28 sps:$4 sm:$0xff]   ;;  %v5521_v0 = vld [vmem:[#allocation6 + $0xbc] ss:$28 sps:$4 sm:$0xff]  }
 0x383   :  { %v5516_v35 = vld [vmem:[#allocation6 + $0x470] ss:$28 sps:$4 sm:$0xff]  }
 0x385   :  { %3918 = vmatpush1.bf16.msra.mxu0 %v5435_v1  ;;  %3961 = vmatpush1.bf16.msra.mxu1 %v5438_v2  ;;  %v5524_v1 = vld [vmem:[#allocation6 + $0x43c] ss:$28 sps:$4 sm:$0xff]  }
 0x386   :  { %3919 = vmatprep.subr.bf16.mxu0 %v5443_v3  ;;  %3962 = vmatprep.subr.bf16.mxu1 %v5446_v5  ;;  %v5519_v2 = vld [vmem:[#allocation6 + $0xb8] ss:$28 sps:$4 sm:$0xff]   ;;  %v5527_v5 = vld [vmem:[#allocation6 + $0x84] ss:$28 sps:$4 sm:$0xff]  }
 0x387   :  { %v5522_v3 = vld [vmem:[#allocation6 + $0x438] ss:$28 sps:$4 sm:$0xff]  }
 0x389   :  { %3920 = vmatpush1.bf16.msra.mxu0 %v5441_v6  ;;  %3963 = vmatpush1.bf16.msra.mxu1 %v5444_v7  ;;  %v5530_v6 = vld [vmem:[#allocation6 + $0x404] ss:$28 sps:$4 sm:$0xff]  }
 0x38a   :  { %3921 = vmatprep.subr.bf16.mxu0 %v5449_v8  ;;  %3964 = vmatprep.subr.bf16.mxu1 %v5452_v9  ;;  %v5525_v7 = vld [vmem:[#allocation6 + $0x80] ss:$28 sps:$4 sm:$0xff]   ;;  %v5533_v9 = vld [vmem:[#allocation6 + $0x4c] ss:$28 sps:$4 sm:$0xff]  }
 0x38b   :  { %v5528_v8 = vld [vmem:[#allocation6 + $0x400] ss:$28 sps:$4 sm:$0xff]  }
 0x38d   :  { %3922 = vmatpush2.bf16.msra.mxu0 %v5447_v10  ;;  %3965 = vmatpush2.bf16.msra.mxu1 %v5450_v12  ;;  %v5536_v10 = vld [vmem:[#allocation6 + $0x3cc] ss:$28 sps:$4 sm:$0xff]  }
 0x38e   :  { %3923 = vmatprep.subr.bf16.mxu0 %v5455_v13  ;;  %3966 = vmatprep.subr.bf16.mxu1 %v5458_v15  ;;  %v5531_v12 = vld [vmem:[#allocation6 + $0x48] ss:$28 sps:$4 sm:$0xff]   ;;  %v5539_v15 = vld [vmem:[#allocation6 + $0x14] ss:$28 sps:$4 sm:$0xff]  }
 0x38f   :  { %v5534_v13 = vld [vmem:[#allocation6 + $0x3c8] ss:$28 sps:$4 sm:$0xff]  }
 0x391   :  { %3924 = vmatpush2.bf16.msra.mxu0 %v5453_v16  ;;  %3967 = vmatpush2.bf16.msra.mxu1 %v5456_v17  ;;  %v5542_v16 = vld [vmem:[#allocation6 + $0x394] ss:$28 sps:$4 sm:$0xff]  }
 0x392   :  { %3925 = vmatprep.subr.bf16.mxu0 %v5461_v18  ;;  %3968 = vmatprep.subr.bf16.mxu1 %v5464_v19  ;;  %v5537_v17 = vld [vmem:[#allocation6 + $0x10] ss:$28 sps:$4 sm:$0xff]   ;;  %v5545_v19 = vld [vmem:[#allocation6 + $0x35c] ss:$28 sps:$4 sm:$0xff]  }
 0x393   :  { %v5540_v18 = vld [vmem:[#allocation6 + $0x390] ss:$28 sps:$4 sm:$0xff]  }
 0x395   :  { %3926 = vmatpush2.bf16.msra.mxu0 %v5459_v20  ;;  %3969 = vmatpush2.bf16.msra.mxu1 %v5462_v21  ;;  %v5548_v20 = vld [vmem:[#allocation6 + $0x6dc] ss:$28 sps:$4 sm:$0xff]  }
 0x396   :  { %3927 = vmatprep.subr.bf16.mxu0 %v5467_v22  ;;  %3970 = vmatprep.subr.bf16.mxu1 %v5470_v23  ;;  %v5543_v21 = vld [vmem:[#allocation6 + $0x358] ss:$28 sps:$4 sm:$0xff]   ;;  %v5551_v23 = vld [vmem:[#allocation6 + $0x324] ss:$28 sps:$4 sm:$0xff]  }
 0x397   :  { %v5546_v22 = vld [vmem:[#allocation6 + $0x6d8] ss:$28 sps:$4 sm:$0xff]  }
 0x399   :  { %3928 = vmatpush2.bf16.msra.mxu0 %v5465_v24  ;;  %3971 = vmatpush2.bf16.msra.mxu1 %v5468_v25  ;;  %v5554_v24 = vld [vmem:[#allocation6 + $0x6a4] ss:$28 sps:$4 sm:$0xff]  }
 0x39a   :  { %3929 = vmatprep.subr.bf16.mxu0 %v5473_v26  ;;  %3972 = vmatprep.subr.bf16.mxu1 %v5476_v27  ;;  %v5549_v25 = vld [vmem:[#allocation6 + $0x320] ss:$28 sps:$4 sm:$0xff]   ;;  %v5557_v27 = vld [vmem:[#allocation6 + $0x2ec] ss:$28 sps:$4 sm:$0xff]  }
 0x39b   :  { %v5552_v26 = vld [vmem:[#allocation6 + $0x6a0] ss:$28 sps:$4 sm:$0xff]  }
 0x39d   :  { %3930 = vmatpush2.bf16.msra.mxu0 %v5471_v28  ;;  %3973 = vmatpush2.bf16.msra.mxu1 %v5474_v29  ;;  %v5560_v28 = vld [vmem:[#allocation6 + $0x66c] ss:$28 sps:$4 sm:$0xff]  }
 0x39e   :  { %3931 = vmatprep.subr.bf16.mxu0 %v5479_v51  ;;  %3974 = vmatprep.subr.bf16.mxu1 %v5482_v30  ;;  %v5555_v29 = vld [vmem:[#allocation6 + $0x2e8] ss:$28 sps:$4 sm:$0xff]   ;;  %v5563_v30 = vld [vmem:[#allocation6 + $0x2b4] ss:$28 sps:$4 sm:$0xff]  }
 0x39f   :  { %v5558_v51 = vld [vmem:[#allocation6 + $0x668] ss:$28 sps:$4 sm:$0xff]  }
 0x3a1   :  { %3932 = vmatpush2.bf16.msra.mxu0 %v5477_v31  ;;  %3975 = vmatpush2.bf16.msra.mxu1 %v5480_v14  ;;  %v5566_v31 = vld [vmem:[#allocation6 + $0x634] ss:$28 sps:$4 sm:$0xff]  }
 0x3a2   :  { %3933 = vmatprep.subr.bf16.mxu0 %v5485_v32  ;;  %3976 = vmatprep.subr.bf16.mxu1 %v5488_v37  ;;  %v5561_v14 = vld [vmem:[#allocation6 + $0x2b0] ss:$28 sps:$4 sm:$0xff]   ;;  %v5569_v37 = vld [vmem:[#allocation6 + $0x27c] ss:$28 sps:$4 sm:$0xff]  }
 0x3a3   :  { %v5564_v32 = vld [vmem:[#allocation6 + $0x630] ss:$28 sps:$4 sm:$0xff]  }
 0x3a5   :  { %3934 = vmatpush2.bf16.msra.mxu0 %v5483_v39  ;;  %3977 = vmatpush2.bf16.msra.mxu1 %v5486_v42  ;;  %v5572_v39 = vld [vmem:[#allocation6 + $0x5fc] ss:$28 sps:$4 sm:$0xff]  }
 0x3a6   :  { %3935 = vmatprep.subr.bf16.mxu0 %v5491_v43  ;;  %3978 = vmatprep.subr.bf16.mxu1 %v5494_v44  ;;  %v5567_v42 = vld [vmem:[#allocation6 + $0x278] ss:$28 sps:$4 sm:$0xff]   ;;  %v5575_v44 = vld [vmem:[#allocation6 + $0x244] ss:$28 sps:$4 sm:$0xff]  }
 0x3a7   :  { %v5570_v43 = vld [vmem:[#allocation6 + $0x5f8] ss:$28 sps:$4 sm:$0xff]  }
 0x3a9   :  { %3936 = vmatpush2.bf16.msra.mxu0 %v5489_v45  ;;  %3979 = vmatpush2.bf16.msra.mxu1 %v5492_v46  ;;  %v5578_v45 = vld [vmem:[#allocation6 + $0x5c4] ss:$28 sps:$4 sm:$0xff]  }
 0x3aa   :  { %3991 = vmatprep.subr.bf16.mxu0 %v5497_v47  ;;  %4034 = vmatprep.subr.bf16.mxu1 %v5500_v48  ;;  %v5573_v46 = vld [vmem:[#allocation6 + $0x240] ss:$28 sps:$4 sm:$0xff]   ;;  %v5581_v48 = vld [vmem:[#allocation6 + $0x20c] ss:$28 sps:$4 sm:$0xff]  }
 0x3ab   :  { %v5576_v47 = vld [vmem:[#allocation6 + $0x5c0] ss:$28 sps:$4 sm:$0xff]  }
 0x3ac   :  { %3938 = vmatmul.mubr.bf16.vlgmr.msra.gmra.mxu0 %v6079_v40  ;;  %3981 = vmatmul.mubr.bf16.vlgmr.msra.gmra.mxu1 %v6081_v41 }
 0x3ad   :  { %3992 = vmatpush1.bf16.msra.mxu0 %v5495_v50  ;;  %4023 = vmatprep.mubr.bf16.mxu0 %v6075_v34  ;;  %v5584_v50 = vld [vmem:[#allocation6 + $0x58c] ss:$28 sps:$4 sm:$0xff]  }
 0x3ae   :  { %4035 = vmatpush1.bf16.msra.mxu1 %v5498_v53  ;;  %4066 = vmatprep.mubr.bf16.mxu1 %v6077_v36  ;;  %v5579_v53 = vld [vmem:[#allocation6 + $0x208] ss:$28 sps:$4 sm:$0xff]  }
 0x3af   :  { %3993 = vmatprep.subr.bf16.mxu0 %v5503_v54  ;;  %4036 = vmatprep.subr.bf16.mxu1 %v5506_v57  ;;  %v5582_v54 = vld [vmem:[#allocation6 + $0x588] ss:$28 sps:$4 sm:$0xff]   ;;  %v5587_v57 = vld [vmem:[#allocation6 + $0x1d4] ss:$28 sps:$4 sm:$0xff]  }
 0x3b1   :  { %3994 = vmatpush1.bf16.msra.mxu0 %v5501_v58  ;;  %v5590_v58 = vld [vmem:[#allocation6 + $0x554] ss:$28 sps:$4 sm:$0xff]  }
 0x3b2   :  { %4037 = vmatpush1.bf16.msra.mxu1 %v5504_v59  ;;  %3995 = vmatprep.subr.bf16.mxu0 %v5509_v4  ;;  %v5585_v59 = vld [vmem:[#allocation6 + $0x1d0] ss:$28 sps:$4 sm:$0xff]  }
 0x3b3   :  { %4038 = vmatprep.subr.bf16.mxu1 %v5512_v49  ;;  %v5588_v4 = vld [vmem:[#allocation6 + $0x550] ss:$28 sps:$4 sm:$0xff]   ;;  %v5591_v49 = vld [vmem:[#allocation6 + $0x360] ss:$28 sps:$4 sm:$0xff]  }
 0x3b5   :  { %3996 = vmatpush1.bf16.msra.mxu0 %v5507_v60  ;;  %v5592_v60 = vld [vmem:[#allocation6 + $0x6e0] ss:$28 sps:$4 sm:$0xff]  }
 0x3b6   :  { %4039 = vmatpush1.bf16.msra.mxu1 %v5510_v61  ;;  %3997 = vmatprep.subr.bf16.mxu0 %v5515_v62  ;;  %v5593_v61 = vld [vmem:[#allocation6 + $0x1a0] ss:$28 sps:$4 sm:$0xff]  }
 0x3b7   :  { %4040 = vmatprep.subr.bf16.mxu1 %v5518_v56  ;;  %v5594_v62 = vld [vmem:[#allocation6 + $0x520] ss:$28 sps:$4 sm:$0xff]   ;;  %v5595_v56 = vld [vmem:[#allocation6 + $0x328] ss:$28 sps:$4 sm:$0xff]  }
 0x3b9   :  { %3998 = vmatpush1.bf16.msra.mxu0 %v5513_v63  ;;  %v5596_v63 = vld [vmem:[#allocation6 + $0x6a8] ss:$28 sps:$4 sm:$0xff]  }
 0x3ba   :  { %4041 = vmatpush1.bf16.msra.mxu1 %v5516_v35  ;;  %3999 = vmatprep.subr.bf16.mxu0 %v5521_v0  ;;  %v5597_v35 = vld [vmem:[#allocation6 + $0x168] ss:$28 sps:$4 sm:$0xff]  }
 0x3bb   :  { %4042 = vmatprep.subr.bf16.mxu1 %v5524_v1  ;;  %v5598_v0 = vld [vmem:[#allocation6 + $0x4e8] ss:$28 sps:$4 sm:$0xff]   ;;  %v5599_v1 = vld [vmem:[#allocation6 + $0x2f0] ss:$28 sps:$4 sm:$0xff]  }
 0x3bd   :  { %4000 = vmatpush1.bf16.msra.mxu0 %v5519_v2  ;;  %v5600_v2 = vld [vmem:[#allocation6 + $0x670] ss:$28 sps:$4 sm:$0xff]  }
 0x3be   :  { %4043 = vmatpush1.bf16.msra.mxu1 %v5522_v3  ;;  %4001 = vmatprep.subr.bf16.mxu0 %v5527_v5  ;;  %v5601_v3 = vld [vmem:[#allocation6 + $0x130] ss:$28 sps:$4 sm:$0xff]  }
 0x3bf   :  { %4044 = vmatprep.subr.bf16.mxu1 %v5530_v6  ;;  %v5602_v5 = vld [vmem:[#allocation6 + $0x4b0] ss:$28 sps:$4 sm:$0xff]   ;;  %v5603_v6 = vld [vmem:[#allocation6 + $0x2b8] ss:$28 sps:$4 sm:$0xff]  }
 0x3c1   :  { %4002 = vmatpush1.bf16.msra.mxu0 %v5525_v7  ;;  %v5604_v7 = vld [vmem:[#allocation6 + $0x638] ss:$28 sps:$4 sm:$0xff]  }
 0x3c2   :  { %4045 = vmatpush1.bf16.msra.mxu1 %v5528_v8  ;;  %4003 = vmatprep.subr.bf16.mxu0 %v5533_v9  ;;  %v5605_v8 = vld [vmem:[#allocation6 + $0xf8] ss:$28 sps:$4 sm:$0xff]   ;;  %v5607_v9 = vld [vmem:[#allocation6 + $0x280] ss:$28 sps:$4 sm:$0xff]  }
 0x3c3   :  { %4046 = vmatprep.subr.bf16.mxu1 %v5536_v10  ;;  %v5608_v10 = vld [vmem:[#allocation6 + $0x600] ss:$28 sps:$4 sm:$0xff]  }
 0x3c5   :  { %4004 = vmatpush1.bf16.msra.mxu0 %v5531_v12  ;;  %v5610_v12 = vld [vmem:[#allocation6 + $0x440] ss:$28 sps:$4 sm:$0xff]  }
 0x3c6   :  { %4047 = vmatpush1.bf16.msra.mxu1 %v5534_v13  ;;  %4005 = vmatprep.subr.bf16.mxu0 %v5539_v15  ;;  %v5611_v13 = vld [vmem:[#allocation6 + $0x248] ss:$28 sps:$4 sm:$0xff]  }
 0x3c7   :  { %4048 = vmatprep.subr.bf16.mxu1 %v5542_v16  ;;  %v5612_v15 = vld [vmem:[#allocation6 + $0x5c8] ss:$28 sps:$4 sm:$0xff]  }
 0x3c8   :  { %v5613_v16 = vld [vmem:[#allocation6 + $0x88] ss:$28 sps:$4 sm:$0xff]  }
 0x3c9   :  { %4006 = vmatpush1.bf16.msra.mxu0 %v5537_v17  ;;  %v5614_v17 = vld [vmem:[#allocation6 + $0x408] ss:$28 sps:$4 sm:$0xff]  }
 0x3ca   :  { %4049 = vmatpush1.bf16.msra.mxu1 %v5540_v18  ;;  %4007 = vmatprep.subr.bf16.mxu0 %v5545_v19  ;;  %v5615_v18 = vld [vmem:[#allocation6 + $0x210] ss:$28 sps:$4 sm:$0xff]  }
 0x3cb   :  { %4050 = vmatprep.subr.bf16.mxu1 %v5548_v20  ;;  %v5616_v19 = vld [vmem:[#allocation6 + $0x590] ss:$28 sps:$4 sm:$0xff]  }
 0x3cc   :  { %v5617_v20 = vld [vmem:[#allocation6 + $0x50] ss:$28 sps:$4 sm:$0xff]  }
 0x3cd   :  { %4008 = vmatpush2.bf16.msra.mxu0 %v5543_v21  ;;  %v5618_v21 = vld [vmem:[#allocation6 + $0x3d0] ss:$28 sps:$4 sm:$0xff]  }
 0x3ce   :  { %4051 = vmatpush2.bf16.msra.mxu1 %v5546_v22  ;;  %4009 = vmatprep.subr.bf16.mxu0 %v5551_v23  ;;  %v5619_v22 = vld [vmem:[#allocation6 + $0x1d8] ss:$28 sps:$4 sm:$0xff]  }
 0x3cf   :  { %4052 = vmatprep.subr.bf16.mxu1 %v5554_v24  ;;  %v5620_v23 = vld [vmem:[#allocation6 + $0x558] ss:$28 sps:$4 sm:$0xff]  }
 0x3d0   :  { %v5621_v24 = vld [vmem:[#allocation6 + $0x18] ss:$28 sps:$4 sm:$0xff]  }
 0x3d1   :  { %4010 = vmatpush2.bf16.msra.mxu0 %v5549_v25  ;;  %v5622_v25 = vld [vmem:[#allocation6 + $0x398] ss:$28 sps:$4 sm:$0xff]  }
 0x3d2   :  { %4053 = vmatpush2.bf16.msra.mxu1 %v5552_v26  ;;  %4011 = vmatprep.subr.bf16.mxu0 %v5557_v27  ;;  %v6102_v26 = vld [vmem:[%s6150_s8] sm:$0xff] }
 0x3d3   :  { %4054 = vmatprep.subr.bf16.mxu1 %v5560_v28  ;;  %v2635_v27 = vrot.slane %v6102_v26, %v6033_v55  ;;  %v2639_v28 = vrot.slane %v6102_v26, %v6041_v11 }
 0x3d5   :  { %4012 = vmatpush2.bf16.msra.mxu0 %v5555_v29 }
 0x3d6   :  { %4055 = vmatpush2.bf16.msra.mxu1 %v5558_v51  ;;  %4013 = vmatprep.subr.bf16.mxu0 %v5563_v30 }
 0x3d7   :  { %4056 = vmatprep.subr.bf16.mxu1 %v5566_v31 }
 0x3d9   :  { %4014 = vmatpush2.bf16.msra.mxu0 %v5561_v14 }
 0x3da   :  { %4057 = vmatpush2.bf16.msra.mxu1 %v5564_v32  ;;  %4015 = vmatprep.subr.bf16.mxu0 %v5569_v37 }
 0x3db   :  { %4058 = vmatprep.subr.bf16.mxu1 %v5572_v39 }
 0x3dd   :  { %4016 = vmatpush2.bf16.msra.mxu0 %v5567_v42 }
 0x3de   :  { %4059 = vmatpush2.bf16.msra.mxu1 %v5570_v43  ;;  %4017 = vmatprep.subr.bf16.mxu0 %v5575_v44 }
 0x3df   :  { %4060 = vmatprep.subr.bf16.mxu1 %v5578_v45 }
 0x3e1   :  { %4018 = vmatpush2.bf16.msra.mxu0 %v5573_v46 }
 0x3e2   :  { %4061 = vmatpush2.bf16.msra.mxu1 %v5576_v47  ;;  %4019 = vmatprep.subr.bf16.mxu0 %v5581_v48 }
 0x3e3   :  { %4062 = vmatprep.subr.bf16.mxu1 %v5584_v50 }
 0x3e5   :  { %4020 = vmatpush2.bf16.msra.mxu0 %v5579_v53 }
 0x3e6   :  { %4063 = vmatpush2.bf16.msra.mxu1 %v5582_v54  ;;  %4021 = vmatprep.subr.bf16.mxu0 %v5587_v57 }
 0x3e7   :  { %4064 = vmatprep.subr.bf16.mxu1 %v5590_v58 }
 0x3e9   :  { %4022 = vmatpush2.bf16.msra.mxu0 %v5585_v59 }
 0x3ea   :  { %4065 = vmatpush2.bf16.msra.mxu1 %v5588_v4  ;;  %4857 = vmatprep.subr.bf16.mxu0 %v5591_v49 }
 0x3eb   :  { %4879 = vmatprep.subr.bf16.mxu1 %v5592_v60 }
 0x3ec   :  { %4024 = vmatmul.mubr.bf16.vlgmr.msra.gmra.mxu0 %v6079_v40 }
 0x3ed   :  { %4067 = vmatmul.mubr.bf16.vlgmr.msra.gmra.mxu1 %v6081_v41  ;;  %4858 = vmatpush3.bf16.msra.mxu0 %v5593_v61 }
 0x3ee   :  { %4109 = vmatprep.mubr.bf16.mxu0 %v6075_v34  ;;  %4880 = vmatpush3.bf16.msra.mxu1 %v5594_v62  ;;  %v5606_v34 = vld [vmem:[#allocation6 + $0x478] ss:$28 sps:$4 sm:$0xff]  }
 0x3ef   :  { %4150 = vmatprep.mubr.bf16.mxu1 %v6077_v36  ;;  %4859 = vmatprep.subr.bf16.mxu0 %v5595_v56  ;;  %v5609_v36 = vld [vmem:[#allocation6 + $0xc0] ss:$28 sps:$4 sm:$0xff]  }
 0x3f0   :  { %4881 = vmatprep.subr.bf16.mxu1 %v5596_v63 }
 0x3f1   :  { %4860 = vmatpush3.bf16.msra.mxu0 %v5597_v35 }
 0x3f2   :  { %4882 = vmatpush3.bf16.msra.mxu1 %v5598_v0  ;;  %4861 = vmatprep.subr.bf16.mxu0 %v5599_v1  ;;  %v2643_v1 = vrot.slane %v6102_v26, %v6049_v33 }
 0x3f3   :  { %4883 = vmatprep.subr.bf16.mxu1 %v5600_v2  ;;  %v2647_v2 = vrot.slane %v6102_v26, %v6052_v38 }
 0x3f5   :  { %4862 = vmatpush3.bf16.msra.mxu0 %v5601_v3 }
 0x3f6   :  { %4884 = vmatpush3.bf16.msra.mxu1 %v5602_v5  ;;  %4863 = vmatprep.subr.bf16.mxu0 %v5603_v6 }
 0x3f7   :  { %4885 = vmatprep.subr.bf16.mxu1 %v5604_v7 }
 0x3f9   :  { %4864 = vmatpush3.bf16.msra.mxu0 %v5605_v8 }
 0x3fa   :  { %4886 = vmatpush3.bf16.msra.mxu1 %v5606_v34  ;;  %4865 = vmatprep.subr.bf16.mxu0 %v5607_v9 }
 0x3fb   :  { %4887 = vmatprep.subr.bf16.mxu1 %v5608_v10 }
 0x3fd   :  { %4866 = vmatpush3.bf16.msra.mxu0 %v5609_v36 }
 0x3fe   :  { %4888 = vmatpush3.bf16.msra.mxu1 %v5610_v12  ;;  %4867 = vmatprep.subr.bf16.mxu0 %v5611_v13 }
 0x3ff   :  { %4889 = vmatprep.subr.bf16.mxu1 %v5612_v15 }
 0x401   :  { %4868 = vmatpush3.bf16.msra.mxu0 %v5613_v16 }
 0x402   :  { %4890 = vmatpush3.bf16.msra.mxu1 %v5614_v17  ;;  %4869 = vmatprep.subr.bf16.mxu0 %v5615_v18 }
 0x403   :  { %4891 = vmatprep.subr.bf16.mxu1 %v5616_v19 }
 0x405   :  { %4870 = vmatpush3.bf16.msra.mxu0 %v5617_v20 }
 0x406   :  { %4892 = vmatpush3.bf16.msra.mxu1 %v5618_v21  ;;  %4871 = vmatprep.subr.bf16.mxu0 %v5619_v22 }
 0x407   :  { %4893 = vmatprep.subr.bf16.mxu1 %v5620_v23 }
 0x409   :  { %4872 = vmatpush3.bf16.msra.mxu0 %v5621_v24 }
 0x40a   :  { %4894 = vmatpush3.bf16.msra.mxu1 %v5622_v25 }
 0x40c   :  { %4110 = vmatmul.mubr.bf16.vlgmr.msra.gmra.mxu0 %v6079_v40 }
 0x40d   :  { %4151 = vmatmul.mubr.bf16.vlgmr.msra.gmra.mxu1 %v6081_v41 }
 0x42c   :  { %v3853_v29 = vpop.f32.mrf.mxu0  ;;  %v3896_v51 = vpop.f32.mrf.mxu1 }
 0x42d   :  { %v3854_v30 = vadd.f32 %v3853_v29, %v2635_v27 }
 0x42e   :  { %v3855_v31 = vpop.f32.mrf.mxu0  ;;  %v3898_v14 = vpop.f32.mrf.mxu1 }
 0x42f   :  { %v3897_v32 = vadd.f32 %v3896_v51, %v3854_v30  ;;  %v3856_v40 = vadd.f32 %v3855_v31, %v2639_v28 }
 0x430   :  { %v3857_v37 = vpop.f32.mrf.mxu0  ;;  %v3900_v41 = vpop.f32.mrf.mxu1 }
 0x431   :  { %v4159_v39 = vmul.f32 0.5, %v3897_v32  ;;  %v3899_v42 = vadd.f32 %v3898_v14, %v3856_v40  ;;  %v3858_v43 = vadd.f32 %v3857_v37, %v2635_v27 }
 0x432   :  { %v3859_v44 = vpop.f32.mrf.mxu0  ;;  %v3902_v47 = vpop.f32.mrf.mxu1 }
 0x433   :  { %5623 = vtanh.f32 %v4159_v39  ;;  %v4160_v45 = vmul.f32 0.5, %v3899_v42  ;;  %v3901_v46 = vadd.f32 %v3900_v41, %v3858_v43  ;;  %v3860_v55 = vadd.f32 %v3859_v44, %v2639_v28 }
 0x434   :  { %v2650_v41 = vsub.s32 4, %v6030_v52  ;;  %v2654_v39 = vsub.s32 5, %v6030_v52 }
 0x435   :  { %5625 = vtanh.f32 %v4160_v45  ;;  %v4166_v11 = vmul.f32 0.5, %v3901_v46  ;;  %v3903_v48 = vadd.f32 %v3902_v47, %v3860_v55 }
 0x436   :  { %v2651_v42 = vrot.slane %v6102_v26, %v2650_v41  ;;  %v2655_v43 = vrot.slane %v6102_v26, %v2654_v39 }
 0x437   :  { %5627 = vtanh.f32 %v4166_v11  ;;  %v4167_v50 = vmul.f32 0.5, %v3903_v48 }
 0x439   :  { %5629 = vtanh.f32 %v4167_v50 }
 0x440   :  { %v5624_v53 = vpop.eup %5623 }
 0x441   :  { %v4187_v54 = vmul.f32 0.5, %v5624_v53 }
 0x442   :  { %v5626_v57 = vpop.eup %5625 }
 0x443   :  { %v4188_v58 = vmul.f32 0.5, %v5626_v57  ;;  %v4201_v4 = vadd.f32 0.5, %v4187_v54 }
 0x444   :  { %v5628_v59 = vpop.eup %5627 }
 0x445   :  { %v4202_v49 = vadd.f32 0.5, %v4188_v58  ;;  %v4194_v60 = vmul.f32 0.5, %v5628_v59 }
 0x446   :  { %v5630_v61 = vpop.eup %5629 }
 0x447   :  { %v4773_v62 = vpack.c.bf16 %v4202_v49, %v4201_v4  ;;  %v4195_v56 = vmul.f32 0.5, %v5630_v61  ;;  %v4208_v63 = vadd.f32 0.5, %v4194_v60 }
 0x449   :  { %4259 = vst [vmem:[%s6151_s9] sm:$0xff] %v4773_v62  ;;  %v4209_v35 = vadd.f32 0.5, %v4195_v56 }
 0x44b   :  { %v4777_v0 = vpack.c.bf16 %v4209_v35, %v4208_v63 }
 0x44d   :  { %4263 = vst [vmem:[%s6151_s9 + $0x1c] sm:$0xff] %v4777_v0 }
 0x46c   :  { %v3939_v3 = vpop.f32.mrf.mxu0  ;;  %v3982_v5 = vpop.f32.mrf.mxu1 }
 0x46d   :  { %v3940_v6 = vadd.f32 %v3939_v3, %v2643_v1 }
 0x46e   :  { %v3941_v7 = vpop.f32.mrf.mxu0  ;;  %v3984_v8 = vpop.f32.mrf.mxu1 }
 0x46f   :  { %v3983_v34 = vadd.f32 %v3982_v5, %v3940_v6  ;;  %v3942_v9 = vadd.f32 %v3941_v7, %v2647_v2 }
 0x470   :  { %v3943_v10 = vpop.f32.mrf.mxu0  ;;  %v3986_v36 = vpop.f32.mrf.mxu1 }
 0x471   :  { %v4161_v12 = vmul.f32 0.5, %v3983_v34  ;;  %v3985_v13 = vadd.f32 %v3984_v8, %v3942_v9  ;;  %v3944_v15 = vadd.f32 %v3943_v10, %v2643_v1 }
 0x472   :  { %v3945_v16 = vpop.f32.mrf.mxu0  ;;  %v3988_v19 = vpop.f32.mrf.mxu1 }
 0x473   :  { %5631 = vtanh.f32 %v4161_v12  ;;  %v4162_v17 = vmul.f32 0.5, %v3985_v13  ;;  %v3987_v18 = vadd.f32 %v3986_v36, %v3944_v15  ;;  %v3946_v33 = vadd.f32 %v3945_v16, %v2647_v2 }
 0x474   :  { %v2658_v12 = vsub.s32 6, %v6030_v52 }
 0x475   :  { %5633 = vtanh.f32 %v4162_v17  ;;  %v4168_v38 = vmul.f32 0.5, %v3987_v18  ;;  %v3989_v20 = vadd.f32 %v3988_v19, %v3946_v33 }
 0x476   :  { %v2659_v17 = vrot.slane %v6102_v26, %v2658_v12 }
 0x477   :  { %5635 = vtanh.f32 %v4168_v38  ;;  %v4169_v21 = vmul.f32 0.5, %v3989_v20 }
 0x479   :  { %5637 = vtanh.f32 %v4169_v21 }
 0x480   :  { %v5632_v22 = vpop.eup %5631 }
 0x481   :  { %v4189_v23 = vmul.f32 0.5, %v5632_v22 }
 0x482   :  { %v5634_v24 = vpop.eup %5633 }
 0x483   :  { %v4190_v25 = vmul.f32 0.5, %v5634_v24  ;;  %v4203_v28 = vadd.f32 0.5, %v4189_v23 }
 0x484   :  { %v5636_v27 = vpop.eup %5635 }
 0x485   :  { %v4204_v29 = vadd.f32 0.5, %v4190_v25  ;;  %v4196_v51 = vmul.f32 0.5, %v5636_v27 }
 0x486   :  { %v5638_v30 = vpop.eup %5637 }
 0x487   :  { %v4774_v31 = vpack.c.bf16 %v4204_v29, %v4203_v28  ;;  %v4197_v14 = vmul.f32 0.5, %v5638_v30  ;;  %v4210_v32 = vadd.f32 0.5, %v4196_v51 }
 0x489   :  { %4260 = vst [vmem:[%s6151_s9 + $0x8] sm:$0xff] %v4774_v31  ;;  %v4211_v40 = vadd.f32 0.5, %v4197_v14 }
 0x48b   :  { %v4778_v37 = vpack.c.bf16 %v4211_v40, %v4210_v32 }
 0x48d   :  { %4264 = vst [vmem:[%s6151_s9 + $0x24] sm:$0xff] %v4778_v37 }
 0x4ac   :  { %v4025_v44 = vpop.f32.mrf.mxu0 }
 0x4ad   :  { %v4026_v45 = vadd.f32 %v4025_v44, %v2651_v42  ;;  %v4068_v46 = vpop.f32.mrf.mxu1 }
 0x4ae   :  { %v4027_v55 = vpop.f32.mrf.mxu0 }
 0x4af   :  { %v4069_v47 = vadd.f32 %v4068_v46, %v4026_v45  ;;  %v4028_v11 = vadd.f32 %v4027_v55, %v2655_v43  ;;  %v4070_v48 = vpop.f32.mrf.mxu1 }
 0x4b0   :  { %v4029_v50 = vpop.f32.mrf.mxu0 }
 0x4b1   :  { %v4163_v53 = vmul.f32 0.5, %v4069_v47  ;;  %v4071_v54 = vadd.f32 %v4070_v48, %v4028_v11  ;;  %v4030_v57 = vadd.f32 %v4029_v50, %v2651_v42  ;;  %v4072_v58 = vpop.f32.mrf.mxu1 }
 0x4b2   :  { %v4031_v59 = vpop.f32.mrf.mxu0 }
 0x4b3   :  { %5639 = vtanh.f32 %v4163_v53  ;;  %v4164_v4 = vmul.f32 0.5, %v4071_v54  ;;  %v4073_v49 = vadd.f32 %v4072_v58, %v4030_v57  ;;  %v4032_v60 = vadd.f32 %v4031_v59, %v2655_v43  ;;  %v4074_v61 = vpop.f32.mrf.mxu1 }
 0x4b5   :  { %5641 = vtanh.f32 %v4164_v4  ;;  %v4170_v62 = vmul.f32 0.5, %v4073_v49  ;;  %v4075_v56 = vadd.f32 %v4074_v61, %v4032_v60 }
 0x4b7   :  { %5643 = vtanh.f32 %v4170_v62  ;;  %v4171_v63 = vmul.f32 0.5, %v4075_v56 }
 0x4b9   :  { %5645 = vtanh.f32 %v4171_v63 }
 0x4c0   :  { %v5640_v35 = vpop.eup %5639 }
 0x4c1   :  { %v4191_v0 = vmul.f32 0.5, %v5640_v35 }
 0x4c2   :  { %v5642_v1 = vpop.eup %5641 }
 0x4c3   :  { %v4192_v2 = vmul.f32 0.5, %v5642_v1  ;;  %v4205_v5 = vadd.f32 0.5, %v4191_v0 }
 0x4c4   :  { %v5644_v3 = vpop.eup %5643 }
 0x4c5   :  { %v4206_v6 = vadd.f32 0.5, %v4192_v2  ;;  %v4198_v7 = vmul.f32 0.5, %v5644_v3 }
 0x4c6   :  { %v5646_v8 = vpop.eup %5645 }
 0x4c7   :  { %v4775_v34 = vpack.c.bf16 %v4206_v6, %v4205_v5  ;;  %v4199_v9 = vmul.f32 0.5, %v5646_v8  ;;  %v4212_v10 = vadd.f32 0.5, %v4198_v7 }
 0x4c9   :  { %4261 = vst [vmem:[%s6151_s9 + $0x10] sm:$0xff] %v4775_v34  ;;  %v4213_v36 = vadd.f32 0.5, %v4199_v9 }
 0x4cb   :  { %v4779_v13 = vpack.c.bf16 %v4213_v36, %v4212_v10 }
 0x4cc   :  { %v4873_v15 = vpop.f32.mrf.mxu0 }
 0x4cd   :  { %4265 = vst [vmem:[%s6151_s9 + $0x2c] sm:$0xff] %v4779_v13  ;;  %v4895_v16 = vpop.f32.mrf.mxu1 }
 0x4ce   :  { %v4874_v18 = vpop.f32.mrf.mxu0 }
 0x4cf   :  { %v4875_v33 = vadd.f32 %v4874_v18, %v4873_v15  ;;  %v4896_v19 = vpop.f32.mrf.mxu1 }
 0x4d0   :  { %v4876_v38 = vpop.f32.mrf.mxu0  ;;  %v4897_v21 = vadd.f32 %v4896_v19, %v4895_v16 }
 0x4d1   :  { %v4112_v20 = vadd.f32 %v4875_v33, %v2659_v17  ;;  %v4898_v22 = vpop.f32.mrf.mxu1 }
 0x4d2   :  { %v4877_v23 = vpop.f32.mrf.mxu0 }
 0x4d3   :  { %v4153_v24 = vadd.f32 %v4897_v21, %v4112_v20  ;;  %v4878_v25 = vadd.f32 %v4877_v23, %v4876_v38  ;;  %v4899_v52 = vpop.f32.mrf.mxu1 }
 0x4d4   :  { %v4900_v29 = vadd.f32 %v4899_v52, %v4898_v22 }
 0x4d5   :  { %v4165_v27 = vmul.f32 0.5, %v4153_v24  ;;  %v4115_v28 = vadd.f32 %v4878_v25, %v2659_v17 }
 0x4d7   :  { %5647 = vtanh.f32 %v4165_v27  ;;  %v4156_v51 = vadd.f32 %v4900_v29, %v4115_v28 }
 0x4d9   :  { %v4172_v30 = vmul.f32 0.5, %v4156_v51 }
 0x4db   :  { %5649 = vtanh.f32 %v4172_v30 }
 0x4e4   :  { %v5648_v31 = vpop.eup %5647 }
 0x4e5   :  { %v4193_v26 = vmul.f32 0.5, %v5648_v31 }
 0x4e7   :  { %v4207_v14 = vadd.f32 0.5, %v4193_v26 }
 0x4e8   :  { %v5650_v32 = vpop.eup %5649 }
 0x4e9   :  { %v4776_v40 = vpack.c.bf16 %v4207_v14, %v4207_v14  ;;  %v4200_v37 = vmul.f32 0.5, %v5650_v32 }
 0x4eb   :  { %4262 = vst [vmem:[%s6151_s9 + $0x18] sm:$0xf] %v4776_v40  ;;  %v4214_v41 = vadd.f32 0.5, %v4200_v37 }
 0x4ed   :  { %v4780_v39 = vpack.c.bf16 %v4214_v41, %v4214_v41 }
 0x4ef   :  { %4266 = vst [vmem:[%s6151_s9 + $0x34] sm:$0xf] %v4780_v39 }
 0x4f0   :  { %4275 = vsyncpa [#allocation3], 1 }
 0x4f1   :  { %4276 = vsyncpa [#allocation5], 1 }

</bundles_post_ra>
